<compile_context>
chip_gen: v7x
topology: tpu7x:2x2x1
jax: 0.10.0
libtpu: 0.0.40
codegen_flags: <defaults>
</compile_context>

<pallas_src>
import functools

import jax
import jax.numpy as jnp
from jax import lax
from jax.experimental import pallas as pl
from jax.experimental.pallas import tpu as pltpu


def _linear_attn_kernel(x_ref, wq_ref, wk_ref, wv_ref, wout_ref, bout_ref,
                        mask_ref, o_ref, *, matmul_dtype, approx_recip, n_valid):
    """One grid step = one (Bt, C, Np) batch tile.

    x_ref:    (Bt, C, Np)      channels on sublanes, (padded) spatial on lanes
    wq/wk/wv: (hidden, C)      sliced rows of the 1x1 qkv conv weight
    wout_ref: (C, hidden)
    bout_ref: (C, 1)           f32
    mask_ref: (hidden, hidden) f32 block-diagonal head mask (1.0 on same-head blocks)
    o_ref:    (Bt, C, Np)
    """
    wq = wq_ref[...]
    wk = wk_ref[...]
    wv = wv_ref[...]
    wout = wout_ref[...]
    bias = bout_ref[...]                       # (C, 1) f32
    mask = mask_ref[...]                       # (hidden, hidden) f32

    batch_tile, _, n_pad = x_ref.shape

    # Static unroll over the batch tile: same per-step-overhead amortization as a batched
    # dot_general, but every matmul stays a plain 2-D, N-lane-dense MXU op (no relayouts).
    for b in range(batch_tile):
        x = x_ref[b].astype(matmul_dtype)      # (C, Np); cast hides under the matmuls

        # 1x1 qkv conv.  q / v straight in the MXU dtype; only k in f32 for the softmax.
        q = jnp.dot(wq, x, preferred_element_type=matmul_dtype)       # (hidden, Np)
        v = jnp.dot(wv, x, preferred_element_type=matmul_dtype)       # (hidden, Np)
        k = jnp.dot(wk, x, preferred_element_type=jnp.float32)        # (hidden, Np) f32

        if n_valid != n_pad:                   # padded lanes must not feed the softmax
            lane = lax.broadcasted_iota(jnp.int32, k.shape, 1)
            k = jnp.where(lane < n_valid, k, -1e30)

        # Softmax over spatial positions (lane axis), per channel, in f32.  The
        # denominator is folded into a per-row scale on the (hidden, hidden) context.
        k_max = jnp.max(k, axis=1, keepdims=True)                      # (hidden, 1)
        k_exp = jnp.exp(k - k_max)                                     # (hidden, Np) f32
        inv_denom = pl.reciprocal(jnp.sum(k_exp, axis=1, keepdims=True),
                                  approx=approx_recip)                 # (hidden, 1)

        # ctx[d, e] = sum_n k_exp[d, n] * v[e, n]  -> one full-width MXU matmul.
        ctx = lax.dot_general(k_exp.astype(matmul_dtype), v,
                              (((1,), (1,)), ((), ())),
                              preferred_element_type=jnp.float32)      # (hidden, hidden)
        # Zero cross-head blocks and apply the softmax normalization as a per-row scale.
        ctx = ctx * mask * inv_denom

        # Reassociated epilogue: w_eff = Wout @ ctx^T (C, hidden), then y = w_eff @ q + b.
        w_eff = lax.dot_general(wout, ctx.astype(matmul_dtype),
                                (((1,), (1,)), ((), ())),
                                preferred_element_type=jnp.float32)    # (C, hidden)
        y = jnp.dot(w_eff.astype(matmul_dtype), q,
                    preferred_element_type=jnp.float32) + bias         # (C, Np)
        o_ref[b] = y.astype(o_ref.dtype)


def _pick_batch_tile(batch, max_tile=8):
    """Largest divisor of `batch` <= max_tile, preferring a grid length >= 2 (megacore)."""
    divisors = [d for d in range(1, min(batch, max_tile) + 1) if batch % d == 0]
    two_step = [d for d in divisors if batch // d >= 2]
    return max(two_step) if two_step else max(divisors)


def linear_attention_2d(x, w_qkv, w_out, b_out, *, heads=4, dim_head=32,
                        use_bf16_matmul=True, batch_tile=None):
    """x: (B, C, H, W) NCHW.  w_qkv: (3*hidden, C, 1, 1) (no bias);
    w_out: (C, hidden, 1, 1); b_out: (C,).
    use_bf16_matmul: bf16 MXU operands with f32 accumulation / f32 softmax — the fast
    path on v5e/v6e/v7x (default).  Set False for a strict-precision f32 path."""
    B, C, H, W = x.shape
    N = H * W
    hidden = heads * dim_head

    matmul_dtype = jnp.bfloat16 if use_bf16_matmul else x.dtype
    out_dtype = x.dtype

    if batch_tile is None:
        batch_tile = _pick_batch_tile(B)
    assert B % batch_tile == 0, "batch_tile must divide batch"

    # Lane-pad N to a multiple of 128 so every (C, N) load/store stays full-lane.
    n_pad = ((N + 127) // 128) * 128
    x_bcn = x.reshape(B, C, N)                       # free reshape, no HBM transpose
    if n_pad != N:
        x_bcn = jnp.pad(x_bcn, ((0, 0), (0, 0), (0, n_pad - N)))

    wqkv_mat = w_qkv.reshape(3 * hidden, C).astype(matmul_dtype)
    wq = wqkv_mat[:hidden]
    wk = wqkv_mat[hidden:2 * hidden]
    wv = wqkv_mat[2 * hidden:]
    wout_mat = w_out.reshape(C, hidden).astype(matmul_dtype)
    bout_mat = b_out.reshape(C, 1).astype(jnp.float32)

    # Block-diagonal head mask, built once (hoisted out of the kernel body); its constant
    # index_map keeps it resident across grid steps.
    head_id = jnp.arange(hidden, dtype=jnp.int32) // dim_head
    head_mask = (head_id[:, None] == head_id[None, :]).astype(jnp.float32)

    kernel = functools.partial(
        _linear_attn_kernel, matmul_dtype=matmul_dtype,
        approx_recip=use_bf16_matmul, n_valid=N)

    const = lambda g: (0, 0)

    # TODO(synk): for very large N (e.g. 128x128+ images on v7x's 64 MiB VMEM) add an
    # N-tile grid axis with online-softmax ctx accumulation; whole-N blocks are fine here.
    y_bcn = pl.pallas_call(
        kernel,
        out_shape=jax.ShapeDtypeStruct((B, C, n_pad), out_dtype),
        grid=(B // batch_tile,),
        in_specs=[
            pl.BlockSpec((batch_tile, C, n_pad), lambda g: (g, 0, 0)),
            pl.BlockSpec((hidden, C), const),          # Wq
            pl.BlockSpec((hidden, C), const),          # Wk
            pl.BlockSpec((hidden, C), const),          # Wv
            pl.BlockSpec((C, hidden), const),          # Wout
            pl.BlockSpec((C, 1), const),               # bias
            pl.BlockSpec((hidden, hidden), const),     # head mask
        ],
        out_specs=pl.BlockSpec((batch_tile, C, n_pad), lambda g: (g, 0, 0)),
        compiler_params=pltpu.CompilerParams(
            dimension_semantics=("parallel",),
            vmem_limit_bytes=48 * 1024 * 1024),
    )(x_bcn, wq, wk, wv, wout_mat, bout_mat, head_mask)

    if n_pad != N:
        y_bcn = y_bcn[..., :N]
    return y_bcn.reshape(B, C, H, W)


def _reference(x, w_qkv, w_out, b_out, *, heads, dim_head):
    """Pure-JAX re-implementation of the PyTorch forward for verification."""
    B, C, H, W = x.shape
    N = H * W
    hidden = heads * dim_head
    qkv = jnp.einsum('bchw,oc->bohw', x, w_qkv.reshape(3 * hidden, C))
    qkv = qkv.reshape(B, 3, heads, dim_head, N)
    q, k, v = qkv[:, 0], qkv[:, 1], qkv[:, 2]                  # (B, heads, dh, N)
    k = jax.nn.softmax(k, axis=-1)
    ctx = jnp.einsum('bhdn,bhen->bhde', k, v)
    out = jnp.einsum('bhde,bhdn->bhen', ctx, q)
    out = out.reshape(B, hidden, H, W)
    return jnp.einsum('bchw,oc->bohw', out, w_out.reshape(C, hidden)) \
        + b_out[None, :, None, None]


if __name__ == "__main__":
    B, dim, H, W = 2, 32, 16, 16
    heads, dim_head = 4, 32
    hidden = heads * dim_head

    key = jax.random.PRNGKey(0)
    kx, kq, kw, kb = jax.random.split(key, 4)

    x = jax.random.normal(kx, (B, dim, H, W), dtype=jnp.float32)

    # Deterministic parameter init (kaiming-uniform-like bounds, as in nn.Conv2d).
    b1 = 1.0 / (dim ** 0.5)
    w_qkv = jax.random.uniform(kq, (3 * hidden, dim, 1, 1), jnp.float32, -b1, b1)
    b2 = 1.0 / (hidden ** 0.5)
    w_out = jax.random.uniform(kw, (dim, hidden, 1, 1), jnp.float32, -b2, b2)
    b_out = jax.random.uniform(kb, (dim,), jnp.float32, -b2, b2)

    y_ref = _reference(x, w_qkv, w_out, b_out, heads=heads, dim_head=dim_head)

    # f32 path (exact reciprocal) — strict check.
    y = linear_attention_2d(x, w_qkv, w_out, b_out, heads=heads, dim_head=dim_head,
                            use_bf16_matmul=False)
    y = jax.block_until_ready(y)
    assert y.shape == (B, dim, H, W)
    assert jnp.allclose(y, y_ref, rtol=2e-4, atol=2e-4), "f32 kernel mismatch vs reference"

    # Default bf16 MXU path (fast path on v5e/v6e/v7x) — loose check (bf16 rounding).
    y_bf16 = linear_attention_2d(x, w_qkv, w_out, b_out, heads=heads, dim_head=dim_head)
    y_bf16 = jax.block_until_ready(y_bf16)
    assert y_bf16.shape == (B, dim, H, W)
    assert jnp.allclose(y_bf16, y_ref, rtol=1e-1, atol=1e-1), "bf16 kernel mismatch vs reference"

    print("KERNEL_OK")
</pallas_src>

<mosaic_0001>
module attributes {stable_mosaic.version = 11 : i64} {
  func.func @_linear_attn_kernel(%arg0: i32, %arg1: memref<1x32x256xf32, #tpu.memory_space<vmem>>, %arg2: memref<128x32xf32, #tpu.memory_space<vmem>>, %arg3: memref<128x32xf32, #tpu.memory_space<vmem>>, %arg4: memref<128x32xf32, #tpu.memory_space<vmem>>, %arg5: memref<32x128xf32, #tpu.memory_space<vmem>>, %arg6: memref<32x1xf32, #tpu.memory_space<vmem>>, %arg7: memref<128x128xf32, #tpu.memory_space<vmem>>, %arg8: memref<1x32x256xf32, #tpu.memory_space<vmem>>) attributes {dimension_semantics = [#tpu.dimension_semantics<parallel>], iteration_bounds = array<i64: 2>, scalar_prefetch = 0 : i64, scratch_operands = 0 : i64, tpu.core_type = #tpu.core_type<tc>, window_params = [{transform_indices = @transform_0, window_bounds = array<i64: 1, 32, 256>}, {pipeline_mode = #tpu.pipeline_mode<synchronous>, transform_indices = @transform_1, window_bounds = array<i64: 128, 32>}, {pipeline_mode = #tpu.pipeline_mode<synchronous>, transform_indices = @transform_2, window_bounds = array<i64: 128, 32>}, {pipeline_mode = #tpu.pipeline_mode<synchronous>, transform_indices = @transform_3, window_bounds = array<i64: 128, 32>}, {pipeline_mode = #tpu.pipeline_mode<synchronous>, transform_indices = @transform_4, window_bounds = array<i64: 32, 128>}, {pipeline_mode = #tpu.pipeline_mode<synchronous>, transform_indices = @transform_5, window_bounds = array<i64: 32, 1>}, {pipeline_mode = #tpu.pipeline_mode<synchronous>, transform_indices = @transform_6, window_bounds = array<i64: 128, 128>}, {transform_indices = @transform_7, window_bounds = array<i64: 1, 32, 256>}]} {
    %c0 = arith.constant 0 : index
    %c0_0 = arith.constant 0 : index
    %0 = vector.load %arg2[%c0, %c0_0] : memref<128x32xf32, #tpu.memory_space<vmem>>, vector<128x32xf32>
    %c0_1 = arith.constant 0 : index
    %c0_2 = arith.constant 0 : index
    %1 = vector.load %arg3[%c0_1, %c0_2] : memref<128x32xf32, #tpu.memory_space<vmem>>, vector<128x32xf32>
    %c0_3 = arith.constant 0 : index
    %c0_4 = arith.constant 0 : index
    %2 = vector.load %arg4[%c0_3, %c0_4] : memref<128x32xf32, #tpu.memory_space<vmem>>, vector<128x32xf32>
    %c0_5 = arith.constant 0 : index
    %c0_6 = arith.constant 0 : index
    %3 = vector.load %arg5[%c0_5, %c0_6] : memref<32x128xf32, #tpu.memory_space<vmem>>, vector<32x128xf32>
    %c0_7 = arith.constant 0 : index
    %c0_8 = arith.constant 0 : index
    %4 = vector.load %arg6[%c0_7, %c0_8] : memref<32x1xf32, #tpu.memory_space<vmem>>, vector<32x1xf32>
    %c0_9 = arith.constant 0 : index
    %c0_10 = arith.constant 0 : index
    %5 = vector.load %arg7[%c0_9, %c0_10] : memref<128x128xf32, #tpu.memory_space<vmem>>, vector<128x128xf32>
    %c0_11 = arith.constant 0 : index
    %c0_12 = arith.constant 0 : index
    %c0_13 = arith.constant 0 : index
    %6 = vector.load %arg1[%c0_11, %c0_12, %c0_13] : memref<1x32x256xf32, #tpu.memory_space<vmem>>, vector<1x32x256xf32>
    %7 = vector.shape_cast %6 : vector<1x32x256xf32> to vector<32x256xf32>
    %cst = arith.constant dense<0.000000e+00> : vector<128x256xf32>
    %8 = tpu.matmul %0, %7, %cst {dimension_numbers = #tpu.dot_dimension_numbers<[1], [0], [0], [1], [0, 0, 1, 1], [], []>} : vector<128x32xf32>, vector<32x256xf32>, vector<128x256xf32> -> vector<128x256xf32>
    %cst_14 = arith.constant dense<0.000000e+00> : vector<128x256xf32>
    %9 = tpu.matmul %2, %7, %cst_14 {dimension_numbers = #tpu.dot_dimension_numbers<[1], [0], [0], [1], [0, 0, 1, 1], [], []>} : vector<128x32xf32>, vector<32x256xf32>, vector<128x256xf32> -> vector<128x256xf32>
    %cst_15 = arith.constant dense<0.000000e+00> : vector<128x256xf32>
    %10 = tpu.matmul %1, %7, %cst_15 {dimension_numbers = #tpu.dot_dimension_numbers<[1], [0], [0], [1], [0, 0, 1, 1], [], []>} : vector<128x32xf32>, vector<32x256xf32>, vector<128x256xf32> -> vector<128x256xf32>
    %cst_16 = arith.constant dense<0xFF800000> : vector<128xf32>
    %11 = vector.multi_reduction <maximumf>, %10, %cst_16 [1] : vector<128x256xf32> to vector<128xf32>
    %12 = vector.shape_cast %11 : vector<128xf32> to vector<128x1xf32>
    %13 = vector.broadcast %12 : vector<128x1xf32> to vector<128x256xf32>
    %14 = arith.subf %10, %13 : vector<128x256xf32>
    %15 = math.exp %14 : vector<128x256xf32>
    %cst_17 = arith.constant dense<0.000000e+00> : vector<128xf32>
    %16 = vector.multi_reduction <add>, %15, %cst_17 [1] : vector<128x256xf32> to vector<128xf32>
    %17 = vector.shape_cast %16 : vector<128xf32> to vector<128x1xf32>
    %18 = tpu.reciprocal %17 : vector<128x1xf32> -> vector<128x1xf32>
    %cst_18 = arith.constant dense<0.000000e+00> : vector<128x128xf32>
    %19 = tpu.matmul %15, %9, %cst_18 {dimension_numbers = #tpu.dot_dimension_numbers<[1], [1], [0], [0], [0, 0, 1, 0], [], []>} : vector<128x256xf32>, vector<128x256xf32>, vector<128x128xf32> -> vector<128x128xf32>
    %20 = arith.mulf %19, %5 : vector<128x128xf32>
    %21 = vector.broadcast %18 : vector<128x1xf32> to vector<128x128xf32>
    %22 = arith.mulf %20, %21 : vector<128x128xf32>
    %cst_19 = arith.constant dense<0.000000e+00> : vector<32x128xf32>
    %23 = tpu.matmul %3, %22, %cst_19 {dimension_numbers = #tpu.dot_dimension_numbers<[1], [1], [0], [0], [0, 0, 1, 0], [], []>} : vector<32x128xf32>, vector<128x128xf32>, vector<32x128xf32> -> vector<32x128xf32>
    %cst_20 = arith.constant dense<0.000000e+00> : vector<32x256xf32>
    %24 = tpu.matmul %23, %8, %cst_20 {dimension_numbers = #tpu.dot_dimension_numbers<[1], [0], [0], [1], [0, 0, 1, 1], [], []>} : vector<32x128xf32>, vector<128x256xf32>, vector<32x256xf32> -> vector<32x256xf32>
    %25 = vector.broadcast %4 : vector<32x1xf32> to vector<32x256xf32>
    %26 = arith.addf %24, %25 : vector<32x256xf32>
    %c0_21 = arith.constant 0 : index
    %c0_22 = arith.constant 0 : index
    %c0_23 = arith.constant 0 : index
    %27 = vector.load %arg8[%c0_21, %c0_22, %c0_23] : memref<1x32x256xf32, #tpu.memory_space<vmem>>, vector<1x32x256xf32>
    %28 = vector.shape_cast %27 : vector<1x32x256xf32> to vector<32x256xf32>
    %29 = vector.shape_cast %26 : vector<32x256xf32> to vector<1x32x256xf32>
    tpu.vector_store %arg8[%c0_21, %c0_22, %c0_23], %29 {strides = array<i32>} : memref<1x32x256xf32, #tpu.memory_space<vmem>>, vector<1x32x256xf32>,
    return
  }
  func.func @transform_0(%arg0: i32) -> (i32, i32, i32) {
    %c0_i32 = arith.constant 0 : i32
    %c0_i32_0 = arith.constant 0 : i32
    %c0_i32_1 = arith.constant 0 : i32
    return %arg0, %c0_i32, %c0_i32_0 : i32, i32, i32
  }
  func.func @transform_1(%arg0: i32) -> (i32, i32) {
    %c0_i32 = arith.constant 0 : i32
    %c0_i32_0 = arith.constant 0 : i32
    %c0_i32_1 = arith.constant 0 : i32
    return %c0_i32, %c0_i32_0 : i32, i32
  }
  func.func @transform_2(%arg0: i32) -> (i32, i32) {
    %c0_i32 = arith.constant 0 : i32
    %c0_i32_0 = arith.constant 0 : i32
    %c0_i32_1 = arith.constant 0 : i32
    return %c0_i32, %c0_i32_0 : i32, i32
  }
  func.func @transform_3(%arg0: i32) -> (i32, i32) {
    %c0_i32 = arith.constant 0 : i32
    %c0_i32_0 = arith.constant 0 : i32
    %c0_i32_1 = arith.constant 0 : i32
    return %c0_i32, %c0_i32_0 : i32, i32
  }
  func.func @transform_4(%arg0: i32) -> (i32, i32) {
    %c0_i32 = arith.constant 0 : i32
    %c0_i32_0 = arith.constant 0 : i32
    %c0_i32_1 = arith.constant 0 : i32
    return %c0_i32, %c0_i32_0 : i32, i32
  }
  func.func @transform_5(%arg0: i32) -> (i32, i32) {
    %c0_i32 = arith.constant 0 : i32
    %c0_i32_0 = arith.constant 0 : i32
    %c0_i32_1 = arith.constant 0 : i32
    return %c0_i32, %c0_i32_0 : i32, i32
  }
  func.func @transform_6(%arg0: i32) -> (i32, i32) {
    %c0_i32 = arith.constant 0 : i32
    %c0_i32_0 = arith.constant 0 : i32
    %c0_i32_1 = arith.constant 0 : i32
    return %c0_i32, %c0_i32_0 : i32, i32
  }
  func.func @transform_7(%arg0: i32) -> (i32, i32, i32) {
    %c0_i32 = arith.constant 0 : i32
    %c0_i32_0 = arith.constant 0 : i32
    %c0_i32_1 = arith.constant 0 : i32
    return %arg0, %c0_i32, %c0_i32_0 : i32, i32, i32
  }
}

</mosaic_0001>

<bundles_post_ra>
// kernel: tpu_custom_call.1
= control target key start
LH: loop header
LB: loop body
LE: loop exit
PB: predicated region body
PF: predicated region fallthrough
CT: control target
= control target key end

     0   :  { %12 = vsyncpa [#allocation3], 0  ;;  %s2833_s0 = inlined_call_operand.vmem [shape: f32[2,32,256], index: 0, kind: input, shape index: {}]   ;;  %s2834_s1 = inlined_call_operand.vmem [shape: f32[128,32], index: 1, kind: input, shape index: {}]   ;;  %s2835_s2 = inlined_call_operand.vmem [shape: f32[128,32], index: 2, kind: input, shape index: {}]   ;;  %s2836_s3 = inlined_call_operand.vmem [shape: f32[128,32], index: 3, kind: input, shape index: {}]   ;;  %s2837_s4 = inlined_call_operand.vmem [shape: f32[32,128], index: 4, kind: input, shape index: {}]   ;;  %s2838_s5 = inlined_call_operand.vmem [shape: f32[32,1], index: 5, kind: input, shape index: {}]   ;;  %s2839_s6 = inlined_call_operand.vmem [shape: f32[128,128], index: 6, kind: input, shape index: {}]   ;;  %s2840_s7 = inlined_call_operand.hbm [shape: f32[2,32,256], index: 7, kind: output, shape index: {}]  }
   0x1   :  { %14 = vsyncpa [#allocation3 + $0x1], 0  ;;  %s2138_s24 = smov 0   ;;  %s2140_s25 = smov 0  }
   0x2   :  { %s2142_s26 = smov 0   ;;  %s2144_s27 = smov 0  }
   0x3 LB: > { %s2159_s28 = sadd.s32 4294967295, %s2091_s27   ;;  %s1648_s29 = sadd.s32 4294967294, %s2091_s27   ;;  %s2091_s27 = sphi %s2144_s27, %s2897_s27   ;;  %s2087_s26 = sphi %s2142_s26, %s2896_s26   ;;  %s2083_s25 = sphi %s2140_s25, %s2895_s25   ;;  %s2079_s24 = sphi %s2138_s24, %s2894_s24  }
   0x4   : > { %s2163_s30 = sadd.s32 1, %s2091_s27   ;;  %s179_s8 = sadd.s32 1, %s2087_s26 }
   0x5   : > { %s176_s9 = ssub.s32 %s2091_s27, %s2163_s30  ;;  %p189_p0 = scmp.ne.s32.totalorder %s2087_s26, %s2083_s25 }
   0x6   : > { %p177_p1 = scmp.eq.s32.totalorder %s176_s9, 0  ;;  %p190_p2 = scmp.eq.s32.totalorder %s2159_s28, 1 }
   0x7   : > { %p195_p3 = scmp.ne.s32.totalorder %s2083_s25, %s2079_s24  ;;  %p196_p4 = scmp.eq.s32.totalorder %s1648_s29, 1 }
   0x8   : > { %s2174_s10 = scalar_select %p177_p1, %s2087_s26, %s179_s8  }
   0x9   : > { %p2176_p5 = por %p190_p2, %p189_p0  ;;  %p2180_p6 = por %p196_p4, %p195_p3 }
   0xa   : > { %p1651_p7 = scmp.ge.s32.totalorder %s2091_s27, 1  ;;  %p240_p8 = scmp.lt.s32.totalorder %s2091_s27, 3 }
   0xc   : > { %p241_p9 = pnand %p1651_p7, %p240_p8 }
   0xe   : > { %244 = sbr.rel (%p241_p9) target bundleno = 1217 (0x4c1), region = 48 }
  0x15   : > { %p272_p10 = scmp.lt.s32.totalorder %s2159_s28, 1  ;;  %v2841_v0 = vmov 0.0   ;;  %v277_v13 = vld [vmem:[%s2834_s1] sm:$0xff]  ;;  %vm357_vm0 = vcmask 261120   ;;  %v278_v15 = vld [vmem:[%s2834_s1 + $0x8] sm:$0xff]  ;;  %v279_v17 = vld [vmem:[%s2834_s1 + $0x10] sm:$0xff] }
  0x16   : > { %470 = vmatprep.mubr.f32.mxu0 %v2841_v0  ;;  %679 = vmatprep.mubr.f32.mxu1 %v2841_v0  ;;  %v309_v14 = vld [vmem:[%s2836_s3] sm:$0xff]  ;;  %v310_v16 = vld [vmem:[%s2836_s3 + $0x8] sm:$0xff]  ;;  %v311_v18 = vld [vmem:[%s2836_s3 + $0x10] sm:$0xff]  ;;  %s269_s22 = sand.u32 1, %s2083_s25   ;;  %s1709_s8 = sshll.u32 %s2159_s28, 10 }
  0x17   : > { %s273_s13 = scalar_select %p272_p10, %s2159_s28, 1  ;;  %v280_v19 = vld [vmem:[%s2834_s1 + $0x18] sm:$0xff]  ;;  %v281_v21 = vld [vmem:[%s2834_s1 + $0x20] sm:$0xff]  ;;  %v282_v23 = vld [vmem:[%s2834_s1 + $0x28] sm:$0xff] }
  0x18   : > { %v312_v20 = vld [vmem:[%s2836_s3 + $0x18] sm:$0xff]  ;;  %v313_v22 = vld [vmem:[%s2836_s3 + $0x20] sm:$0xff]  ;;  %v314_v24 = vld [vmem:[%s2836_s3 + $0x28] sm:$0xff]  ;;  %s1652_s23 = sshll.u32 %s269_s22, 6  ;;  %s2786_s15 = scalar_lea.hbm %s2840_s7, %s1709_s8 }
  0x19   : > { %s1708_s14 = sshll.u32 %s273_s13, 6  ;;  %v283_v25 = vld [vmem:[%s2834_s1 + $0x30] sm:$0xff]  ;;  %v284_v27 = vld [vmem:[%s2834_s1 + $0x38] sm:$0xff]  ;;  %v285_v29 = vld [vmem:[%s2834_s1 + $0x40] sm:$0xff]  ;;  %s271_s29 = scalar_lea.vmem [#allocation2], %s1652_s23 }
  0x1a   : > { %s276_s17 = scalar_lea.vmem %s2833_s0, %s1708_s14  ;;  %v315_v26 = vld [vmem:[%s2836_s3 + $0x30] sm:$0xff]  ;;  %v316_v28 = vld [vmem:[%s2836_s3 + $0x38] sm:$0xff]  ;;  %v317_v30 = vld [vmem:[%s2836_s3 + $0x40] sm:$0xff]  ;;  %s1586_s9 = sshll.u32 %s271_s29, 4  ;;  %s2788_s9 = int_to_ptr.vmem [resolvable:$true] %s1586_s9 }
  0x1b   : > { %v350_v1 = vld [vmem:[%s276_s17 + $0x8] sm:$0xff]  ;;  %v352_v2 = vld [vmem:[%s276_s17 + $0x18] sm:$0xff]  ;;  %v349_v3 = vld [vmem:[%s276_s17] sm:$0xff]  ;;  %s2792_s28 = scalar_lea.sflag [#allocation3], %s269_s22  ;;  %s2029_s16 = scalar_lea.vmem %s2788_s9, 1024 }
  0x1c   : > { %v1768_v4 = vpack.c.bf16 %v352_v2, %v350_v1  ;;  %v351_v5 = vld [vmem:[%s276_s17 + $0x10] sm:$0xff]  ;;  %v354_v6 = vld [vmem:[%s276_s17 + $0x28] sm:$0xff]  ;;  %v356_v7 = vld [vmem:[%s276_s17 + $0x38] sm:$0xff]  ;;  %p2030_p11 = scmp.ne.s32.totalorder %s2788_s9, %s2029_s16 }
  0x1d   : > { %v1770_v8 = vpack.c.bf16 %v351_v5, %v349_v3  ;;  %v1772_v9 = vpack.c.bf16 %v356_v7, %v354_v6  ;;  %v353_v10 = vld [vmem:[%s276_s17 + $0x20] sm:$0xff]  ;;  %v355_v11 = vld [vmem:[%s276_s17 + $0x30] sm:$0xff]  ;;  %v286_v31 = vld [vmem:[%s2834_s1 + $0x48] sm:$0xff]  ;;  %s2095_s17 = smov [#allocation2]  }
  0x1e   : > { %1769 = vmatprep.subr.bf16.mxu0 %v1768_v4  ;;  %1777 = vmatprep.subr.bf16.mxu1 %v1768_v4  ;;  %v1774_v12 = vpack.c.bf16 %v355_v11, %v353_v10  ;;  %v318_v32 = vld [vmem:[%s2836_s3 + $0x48] sm:$0xff]  ;;  %v287_v33 = vld [vmem:[%s2834_s1 + $0x50] sm:$0xff]  ;;  %v288_v35 = vld [vmem:[%s2834_s1 + $0x58] sm:$0xff]  ;;  %p2031_p12 = pnand %p2030_p11, %p2176_p5  ;;  %s2033_s18 = sshll.u32 %s2095_s17, 4  ;;  %s2034_s18 = int_to_ptr.vmem [resolvable:$false] %s2033_s18 }
  0x1f   : > { %1771 = vmatpush1.bf16.msra.mxu0 %v1770_v8  ;;  %1779 = vmatpush1.bf16.msra.mxu1 %v1770_v8  ;;  %v319_v34 = vld [vmem:[%s2836_s3 + $0x50] sm:$0xff]  ;;  %v320_v36 = vld [vmem:[%s2836_s3 + $0x58] sm:$0xff]  ;;  %v289_v37 = vld [vmem:[%s2834_s1 + $0x60] sm:$0xff]  ;;  %s2035_s19 = scalar_lea.vmem %s2034_s18, 2048  ;;  %p2036_p0 = scmp.lt.s32.totalorder %s2788_s9, %s2034_s18 }
  0x20   : > { %1773 = vmatprep.subr.bf16.mxu0 %v1772_v9  ;;  %1781 = vmatprep.subr.bf16.mxu1 %v1772_v9  ;;  %v321_v38 = vld [vmem:[%s2836_s3 + $0x60] sm:$0xff]  ;;  %v290_v39 = vld [vmem:[%s2834_s1 + $0x68] sm:$0xff]  ;;  %v291_v41 = vld [vmem:[%s2834_s1 + $0x70] sm:$0xff]  ;;  %p2032_p13 = pneg %p2031_p12  ;;  %p2037_p1 = scmp.lt.s32.totalorder %s2035_s19, %s2029_s16 }
  0x21   : > { %v322_v40 = vld [vmem:[%s2836_s3 + $0x68] sm:$0xff]  ;;  %v323_v42 = vld [vmem:[%s2836_s3 + $0x70] sm:$0xff]  ;;  %v292_v43 = vld [vmem:[%s2834_s1 + $0x78] sm:$0xff] }
  0x22   : > { %v324_v44 = vld [vmem:[%s2836_s3 + $0x78] sm:$0xff]  ;;  %v293_v45 = vld [vmem:[%s2835_s2] sm:$0xff]  ;;  %v294_v46 = vld [vmem:[%s2835_s2 + $0x8] sm:$0xff]  ;;  %p2038_p2 = por %p2037_p1, %p2036_p0 }
  0x23   : > { %1775 = vmatpush1.bf16.msra.mxu0 %v1774_v12  ;;  %1783 = vmatpush1.bf16.msra.mxu1 %v1774_v12  ;;  %v295_v47 = vld [vmem:[%s2835_s2 + $0x10] sm:$0xff]  ;;  %v296_v48 = vld [vmem:[%s2835_s2 + $0x18] sm:$0xff]  ;;  %v297_v49 = vld [vmem:[%s2835_s2 + $0x20] sm:$0xff] }
  0x24   : > { %1785 = vmatprep.subr.bf16.mxu0 %v1768_v4  ;;  %v298_v50 = vld [vmem:[%s2835_s2 + $0x28] sm:$0xff]  ;;  %v299_v51 = vld [vmem:[%s2835_s2 + $0x30] sm:$0xff]  ;;  %v300_v52 = vld [vmem:[%s2835_s2 + $0x38] sm:$0xff]  ;;  %p2039_p3 = pnand %p2038_p2, %p2032_p13 }
  0x25   : > { %v301_v53 = vld [vmem:[%s2835_s2 + $0x40] sm:$0xff]  ;;  %v302_v54 = vld [vmem:[%s2835_s2 + $0x48] sm:$0xff]  ;;  %v303_v55 = vld [vmem:[%s2835_s2 + $0x50] sm:$0xff] }
  0x26   : > { %1655 = vmatmul.mubr.msk.f32.vlgmr.msra.gmra.mrb[0].mxu0 %vm357_vm0, %v277_v13  ;;  %1671 = vmatmul.mubr.msk.f32.vlgmr.msra.gmra.mrb[0].mxu1 %vm357_vm0, %v309_v14  ;;  %v304_v56 = vld [vmem:[%s2835_s2 + $0x58] sm:$0xff]  ;;  %v305_v57 = vld [vmem:[%s2835_s2 + $0x60] sm:$0xff]  ;;  %v306_v58 = vld [vmem:[%s2835_s2 + $0x68] sm:$0xff] }
  0x27   : > { %1787 = vmatpush1.bf16.msra.mxu0 %v1770_v8  ;;  %476 = vmatprep.mubr.f32.mxu0 %v2841_v0  ;;  %v307_v59 = vld [vmem:[%s2835_s2 + $0x70] sm:$0xff]  ;;  %v308_v60 = vld [vmem:[%s2835_s2 + $0x78] sm:$0xff] }
  0x28   : > { %685 = vmatprep.mubr.f32.mxu1 %v2841_v0  ;;  %1789 = vmatprep.subr.bf16.mxu0 %v1772_v9 }
  0x2a   : > { %1656 = vmatmul.mubr.msk.f32.gmra.mrb[2].mxu0 %vm357_vm0, %v278_v15  ;;  %1672 = vmatmul.mubr.msk.f32.gmra.mrb[2].mxu1 %vm357_vm0, %v310_v16 }
  0x2b   : > { %482 = vmatprep.mubr.f32.mxu0 %v2841_v0  ;;  %691 = vmatprep.mubr.f32.mxu1 %v2841_v0 }
  0x2c   : > { %1791 = vmatpush1.bf16.msra.mxu0 %v1774_v12 }
  0x2e   : > { %1657 = vmatmul.mubr.msk.f32.gmra.mrb[4].mxu0 %vm357_vm0, %v279_v17  ;;  %1673 = vmatmul.mubr.msk.f32.gmra.mrb[4].mxu1 %vm357_vm0, %v311_v18 }
  0x2f   : > { %488 = vmatprep.mubr.f32.mxu0 %v2841_v0  ;;  %697 = vmatprep.mubr.f32.mxu1 %v2841_v0 }
  0x32   : > { %1658 = vmatmul.mubr.msk.f32.gmra.mrb[6].mxu0 %vm357_vm0, %v280_v19  ;;  %1674 = vmatmul.mubr.msk.f32.gmra.mrb[6].mxu1 %vm357_vm0, %v312_v20 }
  0x33   : > { %494 = vmatprep.mubr.f32.mxu0 %v2841_v0  ;;  %703 = vmatprep.mubr.f32.mxu1 %v2841_v0 }
  0x36   : > { %1659 = vmatmul.mubr.msk.f32.gmra.mrb[8].mxu0 %vm357_vm0, %v281_v21  ;;  %1675 = vmatmul.mubr.msk.f32.gmra.mrb[8].mxu1 %vm357_vm0, %v313_v22 }
  0x37   : > { %500 = vmatprep.mubr.f32.mxu0 %v2841_v0  ;;  %709 = vmatprep.mubr.f32.mxu1 %v2841_v0 }
  0x3a   : > { %1660 = vmatmul.mubr.msk.f32.gmra.mrb[10].mxu0 %vm357_vm0, %v282_v23  ;;  %1676 = vmatmul.mubr.msk.f32.gmra.mrb[10].mxu1 %vm357_vm0, %v314_v24 }
  0x3b   : > { %506 = vmatprep.mubr.f32.mxu0 %v2841_v0  ;;  %715 = vmatprep.mubr.f32.mxu1 %v2841_v0 }
  0x3e   : > { %1661 = vmatmul.mubr.msk.f32.gmra.mrb[12].mxu0 %vm357_vm0, %v283_v25  ;;  %1677 = vmatmul.mubr.msk.f32.gmra.mrb[12].mxu1 %vm357_vm0, %v315_v26 }
  0x3f   : > { %512 = vmatprep.mubr.f32.mxu0 %v2841_v0  ;;  %721 = vmatprep.mubr.f32.mxu1 %v2841_v0 }
  0x42   : > { %1662 = vmatmul.mubr.msk.f32.gmra.mrb[14].mxu0 %vm357_vm0, %v284_v27  ;;  %1678 = vmatmul.mubr.msk.f32.gmra.mrb[14].mxu1 %vm357_vm0, %v316_v28 }
  0x43   : > { %518 = vmatprep.mubr.f32.mxu0 %v2841_v0  ;;  %727 = vmatprep.mubr.f32.mxu1 %v2841_v0 }
  0x46   : > { %1663 = vmatmul.mubr.msk.f32.gmra.mrb[16].mxu0 %vm357_vm0, %v285_v29  ;;  %1679 = vmatmul.mubr.msk.f32.gmra.mrb[16].mxu1 %vm357_vm0, %v317_v30 }
  0x47   : > { %524 = vmatprep.mubr.f32.mxu0 %v2841_v0  ;;  %733 = vmatprep.mubr.f32.mxu1 %v2841_v0 }
  0x4a   : > { %1664 = vmatmul.mubr.msk.f32.gmra.mrb[18].mxu0 %vm357_vm0, %v286_v31  ;;  %1680 = vmatmul.mubr.msk.f32.gmra.mrb[18].mxu1 %vm357_vm0, %v318_v32 }
  0x4b   : > { %530 = vmatprep.mubr.f32.mxu0 %v2841_v0  ;;  %739 = vmatprep.mubr.f32.mxu1 %v2841_v0 }
  0x4e   : > { %1665 = vmatmul.mubr.msk.f32.gmra.mrb[20].mxu0 %vm357_vm0, %v287_v33  ;;  %1681 = vmatmul.mubr.msk.f32.gmra.mrb[20].mxu1 %vm357_vm0, %v319_v34 }
  0x4f   : > { %536 = vmatprep.mubr.f32.mxu0 %v2841_v0  ;;  %745 = vmatprep.mubr.f32.mxu1 %v2841_v0 }
  0x52   : > { %1666 = vmatmul.mubr.msk.f32.gmra.mrb[22].mxu0 %vm357_vm0, %v288_v35  ;;  %1682 = vmatmul.mubr.msk.f32.gmra.mrb[22].mxu1 %vm357_vm0, %v320_v36 }
  0x53   : > { %542 = vmatprep.mubr.f32.mxu0 %v2841_v0  ;;  %751 = vmatprep.mubr.f32.mxu1 %v2841_v0 }
  0x56   : > { %1667 = vmatmul.mubr.msk.f32.gmra.mrb[24].mxu0 %vm357_vm0, %v289_v37  ;;  %1683 = vmatmul.mubr.msk.f32.gmra.mrb[24].mxu1 %vm357_vm0, %v321_v38 }
  0x57   : > { %548 = vmatprep.mubr.f32.mxu0 %v2841_v0  ;;  %757 = vmatprep.mubr.f32.mxu1 %v2841_v0 }
  0x5a   : > { %1668 = vmatmul.mubr.msk.f32.gmra.mrb[26].mxu0 %vm357_vm0, %v290_v39  ;;  %1684 = vmatmul.mubr.msk.f32.gmra.mrb[26].mxu1 %vm357_vm0, %v322_v40 }
  0x5b   : > { %554 = vmatprep.mubr.f32.mxu0 %v2841_v0  ;;  %763 = vmatprep.mubr.f32.mxu1 %v2841_v0 }
  0x5e   : > { %1669 = vmatmul.mubr.msk.f32.gmra.mrb[28].mxu0 %vm357_vm0, %v291_v41  ;;  %1685 = vmatmul.mubr.msk.f32.gmra.mrb[28].mxu1 %vm357_vm0, %v323_v42 }
  0x5f   : > { %560 = vmatprep.mubr.f32.mxu0 %v2841_v0  ;;  %769 = vmatprep.mubr.f32.mxu1 %v2841_v0 }
  0x62   : > { %1670 = vmatmul.mubr.msk.f32.gmra.mrb[30].mxu0 %vm357_vm0, %v292_v43  ;;  %1686 = vmatmul.mubr.msk.f32.gmra.mrb[30].mxu1 %vm357_vm0, %v324_v44 }
  0x63   : > { %888 = vmatprep.mubr.f32.mxu0 %v2841_v0 }
  0x66   : > { %1687 = vmatmul.mubr.msk.f32.vlgmr.msra.gmra.mrb[32].mxu0 %vm357_vm0, %v293_v45 }
  0x67   : > { %894 = vmatprep.mubr.f32.mxu0 %v2841_v0 }
  0x6a   : > { %1688 = vmatmul.mubr.msk.f32.gmra.mrb[34].mxu0 %vm357_vm0, %v294_v46 }
  0x6b   : > { %900 = vmatprep.mubr.f32.mxu0 %v2841_v0 }
  0x6e   : > { %1689 = vmatmul.mubr.msk.f32.gmra.mrb[36].mxu0 %vm357_vm0, %v295_v47 }
  0x6f   : > { %906 = vmatprep.mubr.f32.mxu0 %v2841_v0 }
  0x72   : > { %1690 = vmatmul.mubr.msk.f32.gmra.mrb[38].mxu0 %vm357_vm0, %v296_v48 }
  0x73   : > { %912 = vmatprep.mubr.f32.mxu0 %v2841_v0 }
  0x76   : > { %1691 = vmatmul.mubr.msk.f32.gmra.mrb[40].mxu0 %vm357_vm0, %v297_v49 }
  0x77   : > { %918 = vmatprep.mubr.f32.mxu0 %v2841_v0 }
  0x7a   : > { %1692 = vmatmul.mubr.msk.f32.gmra.mrb[42].mxu0 %vm357_vm0, %v298_v50 }
  0x7b   : > { %924 = vmatprep.mubr.f32.mxu0 %v2841_v0 }
  0x7e   : > { %1693 = vmatmul.mubr.msk.f32.gmra.mrb[44].mxu0 %vm357_vm0, %v299_v51 }
  0x7f   : > { %930 = vmatprep.mubr.f32.mxu0 %v2841_v0 }
  0x82   : > { %1694 = vmatmul.mubr.msk.f32.gmra.mrb[46].mxu0 %vm357_vm0, %v300_v52 }
  0x83   : > { %936 = vmatprep.mubr.f32.mxu0 %v2841_v0 }
  0x86   : > { %1695 = vmatmul.mubr.msk.f32.gmra.mrb[48].mxu0 %vm357_vm0, %v301_v53 }
  0x87   : > { %942 = vmatprep.mubr.f32.mxu0 %v2841_v0 }
  0x8a   : > { %1696 = vmatmul.mubr.msk.f32.gmra.mrb[50].mxu0 %vm357_vm0, %v302_v54 }
  0x8b   : > { %948 = vmatprep.mubr.f32.mxu0 %v2841_v0 }
  0x8e   : > { %1697 = vmatmul.mubr.msk.f32.gmra.mrb[52].mxu0 %vm357_vm0, %v303_v55 }
  0x8f   : > { %954 = vmatprep.mubr.f32.mxu0 %v2841_v0 }
  0x92   : > { %1698 = vmatmul.mubr.msk.f32.gmra.mrb[54].mxu0 %vm357_vm0, %v304_v56 }
  0x93   : > { %960 = vmatprep.mubr.f32.mxu0 %v2841_v0 }
  0x96   : > { %1699 = vmatmul.mubr.msk.f32.gmra.mrb[56].mxu0 %vm357_vm0, %v305_v57 }
  0x97   : > { %966 = vmatprep.mubr.f32.mxu0 %v2841_v0 }
  0x9a   : > { %1700 = vmatmul.mubr.msk.f32.gmra.mrb[58].mxu0 %vm357_vm0, %v306_v58 }
  0x9b   : > { %972 = vmatprep.mubr.f32.mxu0 %v2841_v0 }
  0x9e   : > { %1701 = vmatmul.mubr.msk.f32.gmra.mrb[60].mxu0 %vm357_vm0, %v307_v59 }
  0x9f   : > { %978 = vmatprep.mubr.f32.mxu0 %v2841_v0 }
  0xa2   : > { %1702 = vmatmul.mubr.msk.f32.gmra.mrb[62].mxu0 %vm357_vm0, %v308_v60 }
  0xf9   : > { %v2431_v61 = vpop.f32.mrb[0].mxu0  ;;  %v681_v62 = vpop.f32.mrb[0].mxu1 }
  0xfa   : > { %v2433_v63 = vpop.f32.mrb[1].mxu0  ;;  %v683_v1 = vpop.f32.mrb[1].mxu1 }
  0xfd   : > { %v2435_v2 = vpop.f32.mrb[2].mxu0  ;;  %v687_v3 = vpop.f32.mrb[2].mxu1 }
  0xfe   : > { %v1794_v5 = vpack.c.bf16 %v687_v3, %v681_v62  ;;  %v2439_v6 = vpop.f32.mrb[3].mxu0  ;;  %v689_v7 = vpop.f32.mrb[3].mxu1 }
  0xff   : > { %v1856_v8 = vpack.c.bf16 %v2439_v6, %v2433_v63  ;;  %v1792_v9 = vpack.c.bf16 %v689_v7, %v683_v1 }
 0x101   : > { %v2443_v10 = vpop.f32.mrb[4].mxu0  ;;  %1793 = vmatprep.subr.bf16.mxu1 %v1792_v9  ;;  %v693_v11 = vpop.f32.mrb[4].mxu1 }
 0x102   : > { %v2445_v12 = vpop.f32.mrb[5].mxu0  ;;  %1795 = vmatpush1.bf16.xpose.msra.mxu1 %v1794_v5  ;;  %v695_v13 = vpop.f32.mrb[5].mxu1 }
 0x105   : > { %v2447_v14 = vpop.f32.mrb[6].mxu0  ;;  %v699_v15 = vpop.f32.mrb[6].mxu1 }
 0x106   : > { %v1798_v17 = vpack.c.bf16 %v699_v15, %v693_v11  ;;  %v2451_v18 = vpop.f32.mrb[7].mxu0  ;;  %v701_v19 = vpop.f32.mrb[7].mxu1 }
 0x107   : > { %v1796_v21 = vpack.c.bf16 %v701_v19, %v695_v13 }
 0x109   : > { %v2455_v22 = vpop.f32.mrb[8].mxu0  ;;  %1797 = vmatprep.subr.bf16.mxu1 %v1796_v21  ;;  %v705_v23 = vpop.f32.mrb[8].mxu1 }
 0x10a   : > { %v2457_v24 = vpop.f32.mrb[9].mxu0  ;;  %1799 = vmatpush1.bf16.xpose.msra.mxu1 %v1798_v17  ;;  %v707_v25 = vpop.f32.mrb[9].mxu1 }
 0x10d   : > { %v2459_v26 = vpop.f32.mrb[10].mxu0  ;;  %v711_v27 = vpop.f32.mrb[10].mxu1 }
 0x10e   : > { %v1802_v29 = vpack.c.bf16 %v711_v27, %v705_v23  ;;  %v2463_v30 = vpop.f32.mrb[11].mxu0  ;;  %v713_v31 = vpop.f32.mrb[11].mxu1 }
 0x10f   : > { %v1800_v33 = vpack.c.bf16 %v713_v31, %v707_v25 }
 0x111   : > { %v2467_v34 = vpop.f32.mrb[12].mxu0  ;;  %1801 = vmatprep.subr.bf16.mxu1 %v1800_v33  ;;  %v717_v35 = vpop.f32.mrb[12].mxu1 }
 0x112   : > { %v2469_v36 = vpop.f32.mrb[13].mxu0  ;;  %1803 = vmatpush1.bf16.xpose.msra.mxu1 %v1802_v29  ;;  %v719_v37 = vpop.f32.mrb[13].mxu1 }
 0x115   : > { %v2471_v38 = vpop.f32.mrb[14].mxu0  ;;  %v723_v39 = vpop.f32.mrb[14].mxu1 }
 0x116   : > { %v1806_v41 = vpack.c.bf16 %v723_v39, %v717_v35  ;;  %v2475_v42 = vpop.f32.mrb[15].mxu0  ;;  %v725_v43 = vpop.f32.mrb[15].mxu1 }
 0x117   : > { %v1804_v45 = vpack.c.bf16 %v725_v43, %v719_v37 }
 0x119   : > { %v2479_v46 = vpop.f32.mrb[16].mxu0  ;;  %1805 = vmatprep.subr.bf16.mxu1 %v1804_v45  ;;  %v729_v47 = vpop.f32.mrb[16].mxu1 }
 0x11a   : > { %v2481_v48 = vpop.f32.mrb[17].mxu0  ;;  %1807 = vmatpush1.bf16.xpose.msra.mxu1 %v1806_v41  ;;  %v731_v49 = vpop.f32.mrb[17].mxu1 }
 0x11d   : > { %v2483_v50 = vpop.f32.mrb[18].mxu0  ;;  %v735_v51 = vpop.f32.mrb[18].mxu1 }
 0x11e   : > { %v1810_v53 = vpack.c.bf16 %v735_v51, %v729_v47  ;;  %v2487_v54 = vpop.f32.mrb[19].mxu0  ;;  %v737_v55 = vpop.f32.mrb[19].mxu1 }
 0x11f   : > { %v1808_v57 = vpack.c.bf16 %v737_v55, %v731_v49 }
 0x121   : > { %v2491_v58 = vpop.f32.mrb[20].mxu0  ;;  %1809 = vmatprep.subr.bf16.mxu1 %v1808_v57  ;;  %v741_v59 = vpop.f32.mrb[20].mxu1 }
 0x122   : > { %v2493_v60 = vpop.f32.mrb[21].mxu0  ;;  %1811 = vmatpush1.bf16.xpose.msra.mxu1 %v1810_v53  ;;  %v743_v62 = vpop.f32.mrb[21].mxu1 }
 0x125   : > { %v2495_v1 = vpop.f32.mrb[22].mxu0  ;;  %v747_v3 = vpop.f32.mrb[22].mxu1 }
 0x126   : > { %v1814_v7 = vpack.c.bf16 %v747_v3, %v741_v59  ;;  %v2499_v9 = vpop.f32.mrb[23].mxu0  ;;  %v749_v11 = vpop.f32.mrb[23].mxu1 }
 0x127   : > { %v1812_v15 = vpack.c.bf16 %v749_v11, %v743_v62 }
 0x129   : > { %v2503_v17 = vpop.f32.mrb[24].mxu0  ;;  %1813 = vmatprep.subr.bf16.mxu1 %v1812_v15  ;;  %v753_v19 = vpop.f32.mrb[24].mxu1 }
 0x12a   : > { %v2505_v21 = vpop.f32.mrb[25].mxu0  ;;  %1815 = vmatpush1.bf16.xpose.msra.mxu1 %v1814_v7  ;;  %v755_v23 = vpop.f32.mrb[25].mxu1 }
 0x12d   : > { %v2507_v25 = vpop.f32.mrb[26].mxu0  ;;  %v759_v27 = vpop.f32.mrb[26].mxu1 }
 0x12e   : > { %v1818_v31 = vpack.c.bf16 %v759_v27, %v753_v19  ;;  %v2511_v33 = vpop.f32.mrb[27].mxu0  ;;  %v761_v35 = vpop.f32.mrb[27].mxu1 }
 0x12f   : > { %v1816_v39 = vpack.c.bf16 %v761_v35, %v755_v23 }
 0x131   : > { %v2515_v41 = vpop.f32.mrb[28].mxu0  ;;  %1817 = vmatprep.subr.bf16.mxu1 %v1816_v39  ;;  %v765_v43 = vpop.f32.mrb[28].mxu1 }
 0x132   : > { %2856 = vst [vmem:[#allocation5_spill] sm:$0xff] %v2515_v41  ;;  %v2517_v45 = vpop.f32.mrb[29].mxu0  ;;  %1819 = vmatpush1.bf16.xpose.msra.mxu1 %v1818_v31  ;;  %v767_v47 = vpop.f32.mrb[29].mxu1 }
 0x135   : > { %v2519_v49 = vpop.f32.mrb[30].mxu0  ;;  %v771_v51 = vpop.f32.mrb[30].mxu1 }
 0x136   : > { %2857 = vst [vmem:[#allocation6_spill] sm:$0xff] %v2519_v49  ;;  %v1822_v55 = vpack.c.bf16 %v771_v51, %v765_v43  ;;  %v2523_v57 = vpop.f32.mrb[31].mxu0  ;;  %v773_v59 = vpop.f32.mrb[31].mxu1 }
 0x137   : > { %v1820_v3 = vpack.c.bf16 %v773_v59, %v767_v47 }
 0x139   : > { %v2527_v7 = vpop.f32.mrb[32].mxu0  ;;  %1821 = vmatprep.subr.bf16.mxu1 %v1820_v3 }
 0x13a   : > { %v2529_v11 = vpop.f32.mrb[33].mxu0  ;;  %1823 = vmatpush1.bf16.xpose.msra.mxu1 %v1822_v55 }
 0x13b   : > { %1857 = vmatprep.subr.bf16.mxu1 %v1856_v8  ;;  %v985_v15 = vmax.f32 %v2527_v7, %v2529_v11 }
 0x13d   : > { %986 = vmax.xlane.f32.xlu0 %v985_v15  ;;  %v2536_v19 = vpop.f32.mrb[34].mxu0 }
 0x13e   : > { %v2538_v23 = vpop.f32.mrb[35].mxu0 }
 0x13f   : > { %v988_v27 = vmax.f32 %v2536_v19, %v2538_v23 }
 0x141   : > { %989 = vmax.xlane.f32.xlu0 %v988_v27  ;;  %v2542_v31 = vpop.f32.mrb[36].mxu0 }
 0x142   : > { %v2544_v35 = vpop.f32.mrb[37].mxu0 }
 0x143   : > { %v991_v63 = vmax.f32 %v2542_v31, %v2544_v35 }
 0x145   : > { %992 = vmax.xlane.f32.xlu1 %v991_v63  ;;  %v2548_v6 = vpop.f32.mrb[38].mxu0 }
 0x146   : > { %v2550_v8 = vpop.f32.mrb[39].mxu0 }
 0x147   : > { %v994_v39 = vmax.f32 %v2548_v6, %v2550_v8 }
 0x149   : > { %995 = vmax.xlane.f32.xlu1 %v994_v39  ;;  %v2554_v43 = vpop.f32.mrb[40].mxu0 }
 0x14a   : > { %v2556_v47 = vpop.f32.mrb[41].mxu0 }
 0x14b   : > { %v997_v51 = vmax.f32 %v2554_v43, %v2556_v47 }
 0x14d   : > { %998 = vmax.xlane.f32.xlu0 %v997_v51  ;;  %v2560_v55 = vpop.f32.mrb[42].mxu0 }
 0x14e   : > { %v2562_v59 = vpop.f32.mrb[43].mxu0 }
 0x14f   : > { %v1000_v3 = vmax.f32 %v2560_v55, %v2562_v59 }
 0x151   : > { %1001 = vmax.xlane.f32.xlu1 %v1000_v3  ;;  %v2566_v15 = vpop.f32.mrb[44].mxu0 }
 0x152   : > { %v2568_v27 = vpop.f32.mrb[45].mxu0 }
 0x153   : > { %v1003_v63 = vmax.f32 %v2566_v15, %v2568_v27 }
 0x155   : > { %1004 = vmax.xlane.f32.xlu0 %v1003_v63  ;;  %v2572_v39 = vpop.f32.mrb[46].mxu0 }
 0x156   : > { %v2574_v0 = vpop.f32.mrb[47].mxu0 }
 0x157   : > { %v1006_v51 = vmax.f32 %v2572_v39, %v2574_v0 }
 0x159   : > { %1007 = vmax.xlane.f32.xlu1 %v1006_v51  ;;  %v2578_v53 = vpop.f32.mrb[48].mxu0 }
 0x15a   : > { %v2580_v62 = vpop.f32.mrb[49].mxu0 }
 0x15b   : > { %v1009_v3 = vmax.f32 %v2578_v53, %v2580_v62 }
 0x15d   : > { %1010 = vmax.xlane.f32.xlu0 %v1009_v3  ;;  %v2584_v29 = vpop.f32.mrb[50].mxu0 }
 0x15e   : > { %v2586_v37 = vpop.f32.mrb[51].mxu0 }
 0x15f   : > { %v1012_v63 = vmax.f32 %v2584_v29, %v2586_v37 }
 0x161   : > { %1013 = vmax.xlane.f32.xlu1 %v1012_v63  ;;  %v2590_v5 = vpop.f32.mrb[52].mxu0 }
 0x162   : > { %v2592_v13 = vpop.f32.mrb[53].mxu0 }
 0x163   : > { %v1015_v51 = vmax.f32 %v2590_v5, %v2592_v13 }
 0x165   : > { %1016 = vmax.xlane.f32.xlu0 %v1015_v51  ;;  %v2596_v52 = vpop.f32.mrb[54].mxu0 }
 0x166   : > { %2858 = vst [vmem:[#allocation7_spill] sm:$0xff] %v2596_v52  ;;  %v2598_v56 = vpop.f32.mrb[55].mxu0 }
 0x167   : > { %2859 = vst [vmem:[#allocation8_spill] sm:$0xff] %v2598_v56  ;;  %v1018_v3 = vmax.f32 %v2596_v52, %v2598_v56 }
 0x169   : > { %1019 = vmax.xlane.f32.xlu1 %v1018_v3  ;;  %v2602_v40 = vpop.f32.mrb[56].mxu0 }
 0x16a   : > { %2860 = vst [vmem:[#allocation9_spill] sm:$0xff] %v2602_v40  ;;  %v2604_v44 = vpop.f32.mrb[57].mxu0 }
 0x16b   : > { %2861 = vst [vmem:[#allocation10_spill] sm:$0xff] %v2604_v44  ;;  %v1021_v63 = vmax.f32 %v2602_v40, %v2604_v44 }
 0x16d   : > { %1022 = vmax.xlane.f32.xlu0 %v1021_v63  ;;  %v2608_v28 = vpop.f32.mrb[58].mxu0 }
 0x16e   : > { %2862 = vst [vmem:[#allocation11_spill] sm:$0xff] %v2608_v28  ;;  %v2610_v32 = vpop.f32.mrb[59].mxu0 }
 0x16f   : > { %2863 = vst [vmem:[#allocation12_spill] sm:$0xff] %v2610_v32  ;;  %v1024_v51 = vmax.f32 %v2608_v28, %v2610_v32 }
 0x171   : > { %1025 = vmax.xlane.f32.xlu1 %v1024_v51  ;;  %v2614_v16 = vpop.f32.mrb[60].mxu0 }
 0x172   : > { %2864 = vst [vmem:[#allocation13_spill] sm:$0xff] %v2614_v16  ;;  %v2616_v20 = vpop.f32.mrb[61].mxu0 }
 0x173   : > { %2865 = vst [vmem:[#allocation14_spill] sm:$0xff] %v2616_v20  ;;  %v1027_v3 = vmax.f32 %v2614_v16, %v2616_v20 }
 0x175   : > { %1028 = vmax.xlane.f32.xlu0 %v1027_v3  ;;  %v2620_v4 = vpop.f32.mrb[62].mxu0 }
 0x176   : > { %v2622_v44 = vpop.f32.mrb[63].mxu0 }
 0x177   : > { %2866 = vst [vmem:[#allocation15_spill] sm:$0xff] %v2622_v44  ;;  %v1030_v63 = vmax.f32 %v2620_v4, %v2622_v44 }
 0x179   : > { %1031 = vmax.xlane.f32.xlu1 %v1030_v63 }
 0x1ca   : > { %v987_v40 = vpop.xlane.xlu0 %986 }
 0x1cb   : > { %v1033_v32 = vsub.f32 %v2527_v7, %v987_v40  ;;  %v1034_v51 = vsub.f32 %v2529_v11, %v987_v40 }
 0x1cd   : > { %v1065_v28 = vmul.f32 1.442695, %v1033_v32  ;;  %v1067_v41 = vmul.f32 1.442695, %v1034_v51  ;;  %v2868_v51 = vpack.c.bf16 %v2451_v18, %v2445_v12  ;;  %v2870_v18 = vpack.c.bf16 %v2463_v30, %v2457_v24 }
 0x1ce   : > { %v990_v49 = vpop.xlane.xlu0 %989  ;;  %v2872_v30 = vpack.c.bf16 %v2475_v42, %v2469_v36  ;;  %v2874_v42 = vpack.c.bf16 %v2487_v54, %v2481_v48  ;;  %v2876_v54 = vpack.c.bf16 %v2499_v9, %v2493_v60  ;;  %v2878_v9 = vpack.c.bf16 %v2511_v33, %v2505_v21 }
 0x1cf   : > { %1933 = vpow2.f32 %v1065_v28  ;;  %v1035_v20 = vsub.f32 %v2536_v19, %v990_v49  ;;  %v1036_v3 = vsub.f32 %v2538_v23, %v990_v49  ;;  %v2880_v33 = vpack.c.bf16 %v2523_v57, %v2517_v45 }
 0x1d0   : > { %1935 = vpow2.f32 %v1067_v41 }
 0x1d1   : > { %v1069_v16 = vmul.f32 1.442695, %v1035_v20  ;;  %v1071_v56 = vmul.f32 1.442695, %v1036_v3 }
 0x1d2   : > { %v993_v52 = vpop.xlane.xlu1 %992 }
 0x1d3   : > { %1937 = vpow2.f32 %v1069_v16  ;;  %v1037_v63 = vsub.f32 %v2542_v31, %v993_v52  ;;  %v1038_v44 = vsub.f32 %v2544_v35, %v993_v52 }
 0x1d4   : > { %1939 = vpow2.f32 %v1071_v56 }
 0x1d5   : > { %v1073_v7 = vmul.f32 1.442695, %v1037_v63  ;;  %v1075_v40 = vmul.f32 1.442695, %v1038_v44 }
 0x1d6   : > { %v996_v32 = vpop.xlane.xlu1 %995 }
 0x1d7   : > { %1941 = vpow2.f32 %v1073_v7  ;;  %v1039_v28 = vsub.f32 %v2548_v6, %v996_v32  ;;  %v1040_v11 = vsub.f32 %v2550_v8, %v996_v32  ;;  %v2867_v6 = vpack.c.bf16 %v2435_v2, %v2431_v61 }
 0x1d8   : > { %1943 = vpow2.f32 %v1075_v40  ;;  %v2869_v2 = vpack.c.bf16 %v2447_v14, %v2443_v10  ;;  %v2871_v14 = vpack.c.bf16 %v2459_v26, %v2455_v22  ;;  %v2873_v26 = vpack.c.bf16 %v2471_v38, %v2467_v34 }
 0x1d9   : > { %v1934_v49 = vpop.eup %1933  ;;  %v1077_v41 = vmul.f32 1.442695, %v1039_v28  ;;  %v1079_v20 = vmul.f32 1.442695, %v1040_v11  ;;  %v2875_v38 = vpack.c.bf16 %v2483_v50, %v2479_v46  ;;  %v2877_v50 = vpack.c.bf16 %v2495_v1, %v2491_v58 }
 0x1da   : > { %v1936_v19 = vpop.eup %1935  ;;  %v999_v23 = vpop.xlane.xlu0 %998  ;;  %v2879_v1 = vpack.c.bf16 %v2507_v25, %v2503_v17  ;;  %v2883_v25 = vld [vmem:[#allocation6_spill] sm:$0xff] }
 0x1db   : > { %1945 = vpow2.f32 %v1077_v41  ;;  %1257 = vmatprep.mubr.f32.mxu1 %v1936_v19  ;;  %v1041_v16 = vsub.f32 %v2554_v43, %v999_v23  ;;  %v1042_v52 = vsub.f32 %v2556_v47, %v999_v23  ;;  %v1129_v56 = vadd.f32 %v1936_v19, %v1934_v49 }
 0x1dc   : > { %1947 = vpow2.f32 %v1079_v20  ;;  %1258 = vmatmul.mubr.f32.vlgmr.msra.gmra.mrb[32].mxu1 %v1934_v49 }
 0x1dd   : > { %v1938_v44 = vpop.eup %1937  ;;  %v1081_v31 = vmul.f32 1.442695, %v1041_v16  ;;  %v1083_v35 = vmul.f32 1.442695, %v1042_v52  ;;  %1859 = vmatpush1.bf16.msra.mxu1 %v2867_v6  ;;  %1130 = vadd.xlane.f32.xlu0 %v1129_v56 }
 0x1de   : > { %v1940_v8 = vpop.eup %1939  ;;  %1861 = vmatprep.subr.bf16.mxu1 %v2868_v51  ;;  %v1002_v3 = vpop.xlane.xlu1 %1001 }
 0x1df   : > { %1949 = vpow2.f32 %v1081_v31  ;;  %1262 = vmatprep.mubr.f32.mxu1 %v1940_v8  ;;  %v1043_v43 = vsub.f32 %v2560_v55, %v1002_v3  ;;  %v1044_v47 = vsub.f32 %v2562_v59, %v1002_v3  ;;  %v1132_v63 = vadd.f32 %v1940_v8, %v1938_v44 }
 0x1e0   : > { %1951 = vpow2.f32 %v1083_v35  ;;  %1263 = vmatmul.mubr.f32.gmra.mrb[34].mxu1 %v1938_v44 }
 0x1e1   : > { %v1942_v7 = vpop.eup %1941  ;;  %v1085_v40 = vmul.f32 1.442695, %v1043_v43  ;;  %v1087_v61 = vmul.f32 1.442695, %v1044_v47  ;;  %1863 = vmatpush1.bf16.msra.mxu1 %v2869_v2  ;;  %1133 = vadd.xlane.f32.xlu1 %v1132_v63 }
 0x1e2   : > { %v1944_v12 = vpop.eup %1943  ;;  %1865 = vmatprep.subr.bf16.mxu1 %v2870_v18  ;;  %v1005_v32 = vpop.xlane.xlu0 %1004  ;;  %v2884_v18 = vld [vmem:[#allocation5_spill] sm:$0xff] }
 0x1e3   : > { %1953 = vpow2.f32 %v1085_v40  ;;  %1267 = vmatprep.mubr.f32.mxu1 %v1944_v12  ;;  %v1045_v55 = vsub.f32 %v2566_v15, %v1005_v32  ;;  %v1046_v59 = vsub.f32 %v2568_v27, %v1005_v32  ;;  %v1135_v28 = vadd.f32 %v1944_v12, %v1942_v7 }
 0x1e4   : > { %1955 = vpow2.f32 %v1087_v61  ;;  %1268 = vmatmul.mubr.f32.gmra.mrb[36].mxu1 %v1942_v7  ;;  %v2882_v7 = vld [vmem:[#allocation8_spill] sm:$0xff]  ;;  %v2885_v32 = vpack.c.bf16 %v2883_v25, %v2884_v18 }
 0x1e5   : > { %v1946_v11 = vpop.eup %1945  ;;  %v1089_v49 = vmul.f32 1.442695, %v1045_v55  ;;  %v1091_v10 = vmul.f32 1.442695, %v1046_v59  ;;  %1867 = vmatpush1.bf16.msra.mxu1 %v2871_v14  ;;  %1136 = vadd.xlane.f32.xlu0 %v1135_v28  ;;  %v2886_v55 = vld [vmem:[#allocation9_spill] sm:$0xff]  ;;  %v2887_v28 = vld [vmem:[#allocation10_spill] sm:$0xff] }
 0x1e6   : > { %v1948_v24 = vpop.eup %1947  ;;  %1869 = vmatprep.subr.bf16.mxu1 %v2872_v30  ;;  %v1008_v41 = vpop.xlane.xlu1 %1007 }
 0x1e7   : > { %1957 = vpow2.f32 %v1089_v49  ;;  %1272 = vmatprep.mubr.f32.mxu1 %v1948_v24  ;;  %v1047_v15 = vsub.f32 %v2572_v39, %v1008_v41  ;;  %v1048_v27 = vsub.f32 %v2574_v0, %v1008_v41  ;;  %v1138_v20 = vadd.f32 %v1948_v24, %v1946_v11 }
 0x1e8   : > { %1959 = vpow2.f32 %v1091_v10  ;;  %1273 = vmatmul.mubr.f32.gmra.mrb[38].mxu1 %v1946_v11 }
 0x1e9   : > { %v1950_v19 = vpop.eup %1949  ;;  %v1093_v23 = vmul.f32 1.442695, %v1047_v15  ;;  %v1095_v22 = vmul.f32 1.442695, %v1048_v27  ;;  %1871 = vmatpush1.bf16.msra.mxu1 %v2873_v26  ;;  %1139 = vadd.xlane.f32.xlu1 %v1138_v20  ;;  %v2888_v15 = vld [vmem:[#allocation11_spill] sm:$0xff]  ;;  %v2889_v20 = vld [vmem:[#allocation12_spill] sm:$0xff] }
 0x1ea   : > { %v1952_v36 = vpop.eup %1951  ;;  %1873 = vmatprep.subr.bf16.mxu1 %v2874_v42  ;;  %v1011_v16 = vpop.xlane.xlu0 %1010 }
 0x1eb   : > { %1961 = vpow2.f32 %v1093_v23  ;;  %1277 = vmatprep.mubr.f32.mxu1 %v1952_v36  ;;  %v1049_v0 = vsub.f32 %v2578_v53, %v1011_v16  ;;  %v1050_v39 = vsub.f32 %v2580_v62, %v1011_v16  ;;  %v1141_v52 = vadd.f32 %v1952_v36, %v1950_v19 }
 0x1ec   : > { %1963 = vpow2.f32 %v1095_v22  ;;  %1278 = vmatmul.mubr.f32.gmra.mrb[40].mxu1 %v1950_v19 }
 0x1ed   : > { %v1954_v56 = vpop.eup %1953  ;;  %v1097_v44 = vmul.f32 1.442695, %v1049_v0  ;;  %v1099_v34 = vmul.f32 1.442695, %v1050_v39  ;;  %1875 = vmatpush1.bf16.msra.mxu1 %v2875_v38  ;;  %1142 = vadd.xlane.f32.xlu0 %v1141_v52  ;;  %v2890_v0 = vld [vmem:[#allocation13_spill] sm:$0xff]  ;;  %v2891_v52 = vld [vmem:[#allocation14_spill] sm:$0xff] }
 0x1ee   : > { %v1956_v48 = vpop.eup %1955  ;;  %1877 = vmatprep.subr.bf16.mxu1 %v2876_v54  ;;  %v1014_v31 = vpop.xlane.xlu1 %1013 }
 0x1ef   : > { %1965 = vpow2.f32 %v1097_v44  ;;  %1282 = vmatprep.mubr.f32.mxu1 %v1956_v48  ;;  %v1051_v53 = vsub.f32 %v2584_v29, %v1014_v31  ;;  %v1052_v62 = vsub.f32 %v2586_v37, %v1014_v31  ;;  %v1144_v35 = vadd.f32 %v1956_v48, %v1954_v56 }
 0x1f0   : > { %1967 = vpow2.f32 %v1099_v34  ;;  %1283 = vmatmul.mubr.f32.gmra.mrb[42].mxu1 %v1954_v56 }
 0x1f1   : > { %v1958_v6 = vpop.eup %1957  ;;  %v1101_v8 = vmul.f32 1.442695, %v1051_v53  ;;  %v1103_v46 = vmul.f32 1.442695, %v1052_v62  ;;  %1879 = vmatpush1.bf16.msra.mxu1 %v2877_v50  ;;  %1145 = vadd.xlane.f32.xlu1 %v1144_v35  ;;  %v2892_v62 = vld [vmem:[#allocation15_spill] sm:$0xff] }
 0x1f2   : > { %v1960_v60 = vpop.eup %1959  ;;  %1881 = vmatprep.subr.bf16.mxu1 %v2878_v9  ;;  %v1017_v51 = vpop.xlane.xlu0 %1016 }
 0x1f3   : > { %1969 = vpow2.f32 %v1101_v8  ;;  %1287 = vmatprep.mubr.f32.mxu1 %v1960_v60  ;;  %v1053_v29 = vsub.f32 %v2590_v5, %v1017_v51  ;;  %v1054_v37 = vsub.f32 %v2592_v13, %v1017_v51  ;;  %v1147_v3 = vadd.f32 %v1960_v60, %v1958_v6  ;;  %v2881_v5 = vld [vmem:[#allocation7_spill] sm:$0xff] }
 0x1f4   : > { %1971 = vpow2.f32 %v1103_v46  ;;  %1288 = vmatmul.mubr.f32.gmra.mrb[44].mxu1 %v1958_v6 }
 0x1f5   : > { %v1962_v43 = vpop.eup %1961  ;;  %v1105_v47 = vmul.f32 1.442695, %v1053_v29  ;;  %v1107_v58 = vmul.f32 1.442695, %v1054_v37  ;;  %1883 = vmatpush1.bf16.msra.mxu1 %v2879_v1  ;;  %1148 = vadd.xlane.f32.xlu0 %v1147_v3 }
 0x1f6   : > { %v1964_v21 = vpop.eup %1963  ;;  %1885 = vmatprep.subr.bf16.mxu1 %v2880_v33  ;;  %v1020_v63 = vpop.xlane.xlu1 %1019  ;;  %v325_v33 = vld [vmem:[%s2837_s4] sm:$0xff] }
 0x1f7   : > { %1973 = vpow2.f32 %v1105_v47  ;;  %1292 = vmatprep.mubr.f32.mxu1 %v1964_v21  ;;  %v1055_v13 = vsub.f32 %v2881_v5, %v1020_v63  ;;  %v1056_v40 = vsub.f32 %v2882_v7, %v1020_v63  ;;  %v1150_v61 = vadd.f32 %v1964_v21, %v1962_v43  ;;  %1762 = vmatprep.mubr.f32.mxu0 %v325_v33  ;;  %v333_v7 = vld [vmem:[%s2839_s6] sm:$0xff] }
 0x1f8   : > { %1975 = vpow2.f32 %v1107_v58  ;;  %1293 = vmatmul.mubr.f32.gmra.mrb[46].mxu1 %v1962_v43  ;;  %v2893_v21 = vmov 0.0   ;;  %v341_v33 = vld [vmem:[%s2839_s6 + $0x40] sm:$0xff] }
 0x1f9   : > { %v1966_v2 = vpop.eup %1965  ;;  %v1109_v12 = vmul.f32 1.442695, %v1055_v13  ;;  %v1111_v17 = vmul.f32 1.442695, %v1056_v40  ;;  %1887 = vmatpush1.bf16.msra.mxu1 %v2885_v32  ;;  %1151 = vadd.xlane.f32.xlu1 %v1150_v61 }
 0x1fa   : > { %v1968_v45 = vpop.eup %1967  ;;  %v1023_v57 = vpop.xlane.xlu0 %1022 }
 0x1fb   : > { %1977 = vpow2.f32 %v1109_v12  ;;  %1297 = vmatprep.mubr.f32.mxu1 %v1968_v45  ;;  %v1057_v59 = vsub.f32 %v2886_v55, %v1023_v57  ;;  %v1058_v11 = vsub.f32 %v2887_v28, %v1023_v57  ;;  %v1153_v49 = vadd.f32 %v1968_v45, %v1966_v2  ;;  %v334_v12 = vld [vmem:[%s2839_s6 + $0x8] sm:$0xff] }
 0x1fc   : > { %1979 = vpow2.f32 %v1111_v17  ;;  %1298 = vmatmul.mubr.f32.gmra.mrb[48].mxu1 %v1966_v2 }
 0x1fd   : > { %v1970_v10 = vpop.eup %1969  ;;  %v1113_v14 = vmul.f32 1.442695, %v1057_v59  ;;  %v1115_v24 = vmul.f32 1.442695, %v1058_v11  ;;  %1154 = vadd.xlane.f32.xlu0 %v1153_v49  ;;  %v335_v11 = vld [vmem:[%s2839_s6 + $0x10] sm:$0xff] }
 0x1fe   : > { %v1972_v30 = vpop.eup %1971  ;;  %v1026_v41 = vpop.xlane.xlu1 %1025 }
 0x1ff   : > { %1981 = vpow2.f32 %v1113_v14  ;;  %1302 = vmatprep.mubr.f32.mxu1 %v1972_v30  ;;  %v1059_v27 = vsub.f32 %v2888_v15, %v1026_v41  ;;  %v1060_v19 = vsub.f32 %v2889_v20, %v1026_v41  ;;  %v1156_v23 = vadd.f32 %v1972_v30, %v1970_v10  ;;  %v336_v30 = vld [vmem:[%s2839_s6 + $0x18] sm:$0xff] }
 0x200   : > { %1983 = vpow2.f32 %v1115_v24  ;;  %1303 = vmatmul.mubr.f32.gmra.mrb[50].mxu1 %v1970_v10 }
 0x201   : > { %v1974_v22 = vpop.eup %1973  ;;  %v1117_v26 = vmul.f32 1.442695, %v1059_v27  ;;  %v1119_v36 = vmul.f32 1.442695, %v1060_v19  ;;  %1157 = vadd.xlane.f32.xlu1 %v1156_v23 }
 0x202   : > { %v1976_v42 = vpop.eup %1975  ;;  %v1029_v16 = vpop.xlane.xlu0 %1028 }
 0x203   : > { %1985 = vpow2.f32 %v1117_v26  ;;  %1307 = vmatprep.mubr.f32.mxu1 %v1976_v42  ;;  %v1061_v39 = vsub.f32 %v2890_v0, %v1029_v16  ;;  %v1062_v56 = vsub.f32 %v2891_v52, %v1029_v16  ;;  %v1159_v44 = vadd.f32 %v1976_v42, %v1974_v22  ;;  %v337_v42 = vld [vmem:[%s2839_s6 + $0x20] sm:$0xff] }
 0x204   : > { %1987 = vpow2.f32 %v1119_v36  ;;  %1308 = vmatmul.mubr.f32.gmra.mrb[52].mxu1 %v1974_v22 }
 0x205   : > { %v1978_v34 = vpop.eup %1977  ;;  %v1121_v38 = vmul.f32 1.442695, %v1061_v39  ;;  %v1123_v48 = vmul.f32 1.442695, %v1062_v56  ;;  %1160 = vadd.xlane.f32.xlu0 %v1159_v44  ;;  %v338_v56 = vld [vmem:[%s2839_s6 + $0x28] sm:$0xff] }
 0x206   : > { %v1980_v54 = vpop.eup %1979  ;;  %v1032_v31 = vpop.xlane.xlu1 %1031 }
 0x207   : > { %1989 = vpow2.f32 %v1121_v38  ;;  %1312 = vmatprep.mubr.f32.mxu1 %v1980_v54  ;;  %v1063_v53 = vsub.f32 %v2620_v4, %v1032_v31  ;;  %v1064_v35 = vsub.f32 %v2892_v62, %v1032_v31  ;;  %v1162_v6 = vadd.f32 %v1980_v54, %v1978_v34 }
 0x208   : > { %1991 = vpow2.f32 %v1123_v48  ;;  %1313 = vmatmul.mubr.f32.gmra.mrb[54].mxu1 %v1978_v34 }
 0x209   : > { %v1982_v8 = vpop.eup %1981  ;;  %v1125_v46 = vmul.f32 1.442695, %v1063_v53  ;;  %v1127_v50 = vmul.f32 1.442695, %v1064_v35  ;;  %1163 = vadd.xlane.f32.xlu1 %v1162_v6  ;;  %v339_v6 = vld [vmem:[%s2839_s6 + $0x30] sm:$0xff] }
 0x20a   : > { %v1984_v60 = vpop.eup %1983 }
 0x20b   : > { %1993 = vpow2.f32 %v1125_v46  ;;  %1317 = vmatprep.mubr.f32.mxu1 %v1984_v60  ;;  %v1165_v9 = vadd.f32 %v1984_v60, %v1982_v8 }
 0x20c   : > { %1995 = vpow2.f32 %v1127_v50  ;;  %1318 = vmatmul.mubr.f32.gmra.mrb[56].mxu1 %v1982_v8 }
 0x20d   : > { %v1986_v51 = vpop.eup %1985  ;;  %1166 = vadd.xlane.f32.xlu0 %v1165_v9  ;;  %v340_v9 = vld [vmem:[%s2839_s6 + $0x38] sm:$0xff] }
 0x20e   : > { %v1988_v29 = vpop.eup %1987 }
 0x20f   : > { %1322 = vmatprep.mubr.f32.mxu1 %v1988_v29  ;;  %v1168_v4 = vadd.f32 %v1988_v29, %v1986_v51 }
 0x210   : > { %1323 = vmatmul.mubr.f32.gmra.mrb[58].mxu1 %v1986_v51 }
 0x211   : > { %v1990_v37 = vpop.eup %1989  ;;  %1169 = vadd.xlane.f32.xlu1 %v1168_v4 }
 0x212   : > { %v1992_v3 = vpop.eup %1991 }
 0x213   : > { %1327 = vmatprep.mubr.f32.mxu1 %v1992_v3  ;;  %v1171_v43 = vadd.f32 %v1992_v3, %v1990_v37 }
 0x214   : > { %1328 = vmatmul.mubr.f32.gmra.mrb[60].mxu1 %v1990_v37 }
 0x215   : > { %v1994_v47 = vpop.eup %1993  ;;  %1172 = vadd.xlane.f32.xlu0 %v1171_v43 }
 0x216   : > { %v1996_v58 = vpop.eup %1995 }
 0x217   : > { %1332 = vmatprep.mubr.f32.mxu1 %v1996_v58  ;;  %v1174_v1 = vadd.f32 %v1996_v58, %v1994_v47 }
 0x218   : > { %1333 = vmatmul.mubr.f32.gmra.mrb[62].mxu1 %v1994_v47 }
 0x219   : > { %1175 = vadd.xlane.f32.xlu1 %v1174_v1  ;;  %1539 = vmatprep.mubr.f32.mxu1 %v2893_v21 }
 0x26a   : > { %v1131_v63 = vpop.xlane.xlu0 %1130 }
 0x26b   : > { %1997 = vrcp.f32 %v1131_v63 }
 0x26e   : > { %v1134_v5 = vpop.xlane.xlu1 %1133 }
 0x26f   : > { %1999 = vrcp.f32 %v1134_v5 }
 0x272   : > { %v1137_v13 = vpop.xlane.xlu0 %1136 }
 0x273   : > { %2001 = vrcp.f32 %v1137_v13 }
 0x275   : > { %v1998_v18 = vpop.eup %1997 }
 0x276   : > { %v1140_v61 = vpop.xlane.xlu1 %1139 }
 0x277   : > { %2003 = vrcp.f32 %v1140_v61 }
 0x279   : > { %v2000_v57 = vpop.eup %1999 }
 0x27a   : > { %v1143_v28 = vpop.xlane.xlu0 %1142 }
 0x27b   : > { %2005 = vrcp.f32 %v1143_v28 }
 0x27d   : > { %v2002_v27 = vpop.eup %2001 }
 0x27e   : > { %v1146_v10 = vpop.xlane.xlu1 %1145 }
 0x27f   : > { %2007 = vrcp.f32 %v1146_v10  ;;  %v344_v10 = vld [vmem:[%s2839_s6 + $0x58] sm:$0xff] }
 0x281   : > { %v2004_v23 = vpop.eup %2003 }
 0x282   : > { %v1149_v36 = vpop.xlane.xlu0 %1148 }
 0x283   : > { %2009 = vrcp.f32 %v1149_v36 }
 0x285   : > { %v2006_v38 = vpop.eup %2005 }
 0x286   : > { %v1152_v0 = vpop.xlane.xlu1 %1151 }
 0x287   : > { %2011 = vrcp.f32 %v1152_v0  ;;  %v346_v0 = vld [vmem:[%s2839_s6 + $0x68] sm:$0xff] }
 0x289   : > { %v2008_v31 = vpop.eup %2007 }
 0x28a   : > { %v1155_v35 = vpop.xlane.xlu0 %1154 }
 0x28b   : > { %2013 = vrcp.f32 %v1155_v35 }
 0x28d   : > { %v2010_v4 = vpop.eup %2009 }
 0x28e   : > { %v1158_v46 = vpop.xlane.xlu1 %1157 }
 0x28f   : > { %2015 = vrcp.f32 %v1158_v46 }
 0x291   : > { %v2012_v43 = vpop.eup %2011 }
 0x292   : > { %v1161_v1 = vpop.xlane.xlu0 %1160 }
 0x293   : > { %2017 = vrcp.f32 %v1161_v1  ;;  %v329_v1 = vld [vmem:[%s2838_s5] sm:$0xff] }
 0x296   : > { %v1164_v5 = vpop.xlane.xlu1 %1163 }
 0x297   : > { %2019 = vrcp.f32 %v1164_v5  ;;  %v332_v5 = vld [vmem:[%s2838_s5 + $0x18] sm:$0xff] }
 0x29e   : > { %v1170_v28 = vpop.xlane.xlu1 %1169 }
 0x2a6   : > { %v1176_v36 = vpop.xlane.xlu1 %1175 }
 0x2af   : > { %v1259_v40 = vpop.f32.mrb[32].mxu1 }
 0x2b0   : > { %v1261_v2 = vpop.f32.mrb[33].mxu1  ;;  %v1338_v17 = vmul.f32 %v1259_v40, %v333_v7  ;;  %v342_v40 = vld [vmem:[%s2839_s6 + $0x48] sm:$0xff] }
 0x2b2   : > { %v1354_v55 = vmul.f32 %v1998_v18, %v1338_v17 }
 0x2b3   : > { %v1264_v25 = vpop.f32.mrb[34].mxu1 }
 0x2b4   : > { %v1339_v32 = vmul.f32 %v1264_v25, %v334_v12  ;;  %v1266_v45 = vpop.f32.mrb[35].mxu1  ;;  %v2014_v12 = vpop.eup %2013 }
 0x2b5   : > { %v2016_v18 = vpop.eup %2015 }
 0x2b6   : > { %v1355_v59 = vmul.f32 %v2000_v57, %v1339_v32  ;;  %v1167_v57 = vpop.xlane.xlu0 %1166 }
 0x2b7   : > { %v1269_v49 = vpop.f32.mrb[36].mxu1  ;;  %2021 = vrcp.f32 %v1167_v57 }
 0x2b8   : > { %v1271_v14 = vpop.f32.mrb[37].mxu1  ;;  %v1824_v24 = vpack.c.bf16 %v1355_v59, %v1354_v55  ;;  %v1340_v41 = vmul.f32 %v1269_v49, %v335_v11  ;;  %v343_v55 = vld [vmem:[%s2839_s6 + $0x50] sm:$0xff]  ;;  %2023 = vrcp.f32 %v1170_v28 }
 0x2ba   : > { %1825 = vmatprep.subr.bf16.mxu0 %v1824_v24  ;;  %v1356_v22 = vmul.f32 %v2002_v27, %v1340_v41 }
 0x2bb   : > { %v1274_v15 = vpop.f32.mrb[38].mxu1  ;;  %1827 = vmatpush3.bf16.xpose.msra.mxu0 %v1824_v24 }
 0x2bc   : > { %v1341_v20 = vmul.f32 %v1274_v15, %v336_v30  ;;  %v1276_v19 = vpop.f32.mrb[39].mxu1  ;;  %v2018_v30 = vpop.eup %2017 }
 0x2bd   : > { %v2020_v27 = vpop.eup %2019 }
 0x2be   : > { %v1357_v26 = vmul.f32 %v2004_v23, %v1341_v20  ;;  %v1173_v23 = vpop.xlane.xlu0 %1172 }
 0x2bf   : > { %v1279_v16 = vpop.f32.mrb[40].mxu1  ;;  %2025 = vrcp.f32 %v1173_v23 }
 0x2c0   : > { %v1281_v39 = vpop.f32.mrb[41].mxu1  ;;  %v1828_v52 = vpack.c.bf16 %v1357_v26, %v1356_v22  ;;  %v1342_v44 = vmul.f32 %v1279_v16, %v337_v42  ;;  %v345_v22 = vld [vmem:[%s2839_s6 + $0x60] sm:$0xff]  ;;  %2027 = vrcp.f32 %v1176_v36 }
 0x2c2   : > { %1829 = vmatprep.subr.bf16.mxu0 %v1828_v52  ;;  %v1358_v53 = vmul.f32 %v2006_v38, %v1342_v44 }
 0x2c3   : > { %v1284_v34 = vpop.f32.mrb[42].mxu1  ;;  %1831 = vmatpush3.bf16.xpose.msra.mxu0 %v1828_v52 }
 0x2c4   : > { %v1343_v48 = vmul.f32 %v1284_v34, %v338_v56  ;;  %v1286_v54 = vpop.f32.mrb[43].mxu1  ;;  %v2022_v56 = vpop.eup %2021 }
 0x2c5   : > { %v2024_v38 = vpop.eup %2023 }
 0x2c6   : > { %v1359_v62 = vmul.f32 %v2008_v31, %v1343_v48  ;;  %v347_v31 = vld [vmem:[%s2839_s6 + $0x70] sm:$0xff] }
 0x2c7   : > { %v1289_v8 = vpop.f32.mrb[44].mxu1 }
 0x2c8   : > { %v1291_v50 = vpop.f32.mrb[45].mxu1  ;;  %v1832_v60 = vpack.c.bf16 %v1359_v62, %v1358_v53  ;;  %v1344_v51 = vmul.f32 %v1289_v8, %v339_v6  ;;  %v348_v6 = vld [vmem:[%s2839_s6 + $0x78] sm:$0xff] }
 0x2c9   : > { %v2026_v50 = vpop.eup %2025 }
 0x2ca   : > { %1833 = vmatprep.subr.bf16.mxu0 %v1832_v60  ;;  %v1360_v47 = vmul.f32 %v2010_v4, %v1344_v51  ;;  %v2028_v51 = vpop.eup %2027 }
 0x2cb   : > { %v1294_v29 = vpop.f32.mrb[46].mxu1  ;;  %1835 = vmatpush3.bf16.xpose.msra.mxu0 %v1832_v60 }
 0x2cc   : > { %v1345_v37 = vmul.f32 %v1294_v29, %v340_v9  ;;  %v1296_v3 = vpop.f32.mrb[47].mxu1 }
 0x2cd   : > { %v326_v3 = vld [vmem:[%s2837_s4 + $0x8] sm:$0xff] }
 0x2ce   : > { %v1361_v58 = vmul.f32 %v2012_v43, %v1345_v37  ;;  %v327_v43 = vld [vmem:[%s2837_s4 + $0x10] sm:$0xff] }
 0x2cf   : > { %v1299_v63 = vpop.f32.mrb[48].mxu1 }
 0x2d0   : > { %v1301_v13 = vpop.f32.mrb[49].mxu1  ;;  %v1836_v7 = vpack.c.bf16 %v1361_v58, %v1360_v47  ;;  %v1346_v61 = vmul.f32 %v1299_v63, %v341_v33  ;;  %v328_v47 = vld [vmem:[%s2837_s4 + $0x18] sm:$0xff]  ;;  %v330_v58 = vld [vmem:[%s2838_s5 + $0x8] sm:$0xff]  ;;  %v2094_v33 = vmov 0   ;;  %v331_v63 = vld [vmem:[%s2838_s5 + $0x10] sm:$0xff] }
 0x2d1   : > { %1932 = vset.pattern.permute.xlu1 %v2094_v33  ;;  %1931 = vset.pattern.permute.xlu0 %v2094_v33 }
 0x2d2   : > { %1837 = vmatprep.subr.bf16.mxu0 %v1836_v7  ;;  %v1362_v32 = vmul.f32 %v2014_v12, %v1346_v61  ;;  %1462 = vperm.xlu1 %1932, %v330_v58  }
 0x2d3   : > { %v1304_v2 = vpop.f32.mrb[50].mxu1  ;;  %1839 = vmatpush3.bf16.xpose.msra.mxu0 %v1836_v7  ;;  %1457 = vperm.xlu0 %1931, %v329_v1  }
 0x2d4   : > { %v1347_v17 = vmul.f32 %v1304_v2, %v342_v40  ;;  %v1306_v25 = vpop.f32.mrb[51].mxu1 }
 0x2d6   : > { %v1363_v45 = vmul.f32 %v2016_v18, %v1347_v17  ;;  %1467 = vperm.xlu1 %1932, %v331_v63  }
 0x2d7   : > { %v1309_v59 = vpop.f32.mrb[52].mxu1 }
 0x2d8   : > { %v1311_v11 = vpop.f32.mrb[53].mxu1  ;;  %v1840_v49 = vpack.c.bf16 %v1363_v45, %v1362_v32  ;;  %v1348_v14 = vmul.f32 %v1309_v59, %v343_v55 }
 0x2da   : > { %1841 = vmatprep.subr.bf16.mxu0 %v1840_v49  ;;  %v1364_v20 = vmul.f32 %v2018_v30, %v1348_v14  ;;  %1472 = vperm.xlu1 %1932, %v332_v5  }
 0x2db   : > { %v1314_v24 = vpop.f32.mrb[54].mxu1  ;;  %1843 = vmatpush3.bf16.xpose.msra.mxu0 %v1840_v49 }
 0x2dc   : > { %v1349_v41 = vmul.f32 %v1314_v24, %v344_v10  ;;  %v1316_v15 = vpop.f32.mrb[55].mxu1 }
 0x2de   : > { %v1365_v19 = vmul.f32 %v2020_v27, %v1349_v41 }
 0x2df   : > { %v1319_v26 = vpop.f32.mrb[56].mxu1 }
 0x2e0   : > { %v1321_v42 = vpop.f32.mrb[57].mxu1  ;;  %v1844_v16 = vpack.c.bf16 %v1365_v19, %v1364_v20  ;;  %v1350_v39 = vmul.f32 %v1319_v26, %v345_v22 }
 0x2e2   : > { %1845 = vmatprep.subr.bf16.mxu0 %v1844_v16  ;;  %v1366_v48 = vmul.f32 %v2022_v56, %v1350_v39 }
 0x2e3   : > { %v1324_v52 = vpop.f32.mrb[58].mxu1  ;;  %1847 = vmatpush3.bf16.xpose.msra.mxu0 %v1844_v16 }
 0x2e4   : > { %v1351_v44 = vmul.f32 %v1324_v52, %v346_v0  ;;  %v1326_v34 = vpop.f32.mrb[59].mxu1 }
 0x2e6   : > { %v1367_v54 = vmul.f32 %v2024_v38, %v1351_v44 }
 0x2e7   : > { %v1329_v53 = vpop.f32.mrb[60].mxu1 }
 0x2e8   : > { %v1331_v62 = vpop.f32.mrb[61].mxu1  ;;  %v1848_v35 = vpack.c.bf16 %v1367_v54, %v1366_v48  ;;  %v1352_v8 = vmul.f32 %v1329_v53, %v347_v31 }
 0x2ea   : > { %1849 = vmatprep.subr.bf16.mxu0 %v1848_v35  ;;  %v1368_v29 = vmul.f32 %v2026_v50, %v1352_v8 }
 0x2eb   : > { %v1334_v46 = vpop.f32.mrb[62].mxu1  ;;  %1851 = vmatpush3.bf16.xpose.msra.mxu0 %v1848_v35 }
 0x2ec   : > { %v1353_v60 = vmul.f32 %v1334_v46, %v348_v6  ;;  %v1336_v9 = vpop.f32.mrb[63].mxu1 }
 0x2ee   : > { %v1369_v4 = vmul.f32 %v2028_v51, %v1353_v60 }
 0x2f0   : > { %v1852_v37 = vpack.c.bf16 %v1369_v4, %v1368_v29 }
 0x2f2   : > { %1853 = vmatprep.subr.bf16.mxu0 %v1852_v37 }
 0x2f3   : > { %1855 = vmatpush3.bf16.xpose.msra.mxu0 %v1852_v37 }
 0x2fa   : > { %1763 = vmatmul.mubr.f32.vlgmr.msra.gmra.mrb[64].mxu0 %v326_v3 }
 0x2fb   : > { %1765 = vmatprep.mubr.f32.mxu0 %v327_v43 }
 0x2fe   : > { %1766 = vmatmul.mubr.f32.gmra.mrb[66].mxu0 %v328_v47 }
 0x351   : > { %v1463_v12 = vpop.permute.xlu1 %1462 }
 0x352   : > { %v1458_v2 = vpop.permute.xlu0 %1457 }
 0x355   : > { %v1468_v59 = vpop.permute.xlu1 %1467 }
 0x359   : > { %v1473_v14 = vpop.permute.xlu1 %1472 }
 0x3cd   : > { %v1764_v13 = vpop.f32.mrb[64].mxu0 }
 0x3ce   : > { %v1436_v7 = vpop.f32.mrb[65].mxu0 }
 0x3cf   : > { %1540 = vmatmul.mubr.f32.vlgmr.msra.gmra.mrb[64].mxu1 %v1436_v7 }
 0x3d0   : > { %1545 = vmatprep.mubr.f32.mxu1 %v2893_v21 }
 0x3d1   : > { %v1767_v40 = vpop.f32.mrb[66].mxu0 }
 0x3d2   : > { %v1446_v61 = vpop.f32.mrb[67].mxu0 }
 0x3d3   : > { %1546 = vmatmul.mubr.f32.gmra.mrb[66].mxu1 %v1764_v13 }
 0x3d4   : > { %1551 = vmatprep.mubr.f32.mxu1 %v2893_v21 }
 0x3d7   : > { %1552 = vmatmul.mubr.f32.gmra.mrb[68].mxu1 %v1446_v61 }
 0x3d8   : > { %1557 = vmatprep.mubr.f32.mxu1 %v2893_v21 }
 0x3db   : > { %1558 = vmatmul.mubr.f32.gmra.mrb[70].mxu1 %v1767_v40 }
 0x4a2   : > { %v1541_v17 = vpop.f32.mrb[64].mxu1 }
 0x4a3   : > { %v1542_v25 = vadd.f32 %v1541_v17, %v1458_v2  ;;  %v1543_v18 = vpop.f32.mrb[65].mxu1 }
 0x4a4   : > { %v1544_v32 = vadd.f32 %v1543_v18, %v1458_v2 }
 0x4a5   : > { %1564 = vst [vmem:[%s271_s29] sm:$0xff] %v1542_v25 }
 0x4a6   : > { %1565 = vst [vmem:[%s271_s29 + $0x8] sm:$0xff] %v1544_v32  ;;  %v1547_v45 = vpop.f32.mrb[66].mxu1 }
 0x4a7   : > { %v1548_v57 = vadd.f32 %v1547_v45, %v1463_v12  ;;  %v1549_v55 = vpop.f32.mrb[67].mxu1 }
 0x4a8   : > { %v1550_v28 = vadd.f32 %v1549_v55, %v1463_v12 }
 0x4a9   : > { %1566 = vst [vmem:[%s271_s29 + $0x10] sm:$0xff] %v1548_v57 }
 0x4aa   : > { %1567 = vst [vmem:[%s271_s29 + $0x18] sm:$0xff] %v1550_v28  ;;  %v1553_v21 = vpop.f32.mrb[68].mxu1 }
 0x4ab   : > { %v1554_v11 = vadd.f32 %v1553_v21, %v1468_v59  ;;  %v1555_v49 = vpop.f32.mrb[69].mxu1 }
 0x4ac   : > { %v1556_v10 = vadd.f32 %v1555_v49, %v1468_v59 }
 0x4ad   : > { %1568 = vst [vmem:[%s271_s29 + $0x20] sm:$0xff] %v1554_v11 }
 0x4ae   : > { %1569 = vst [vmem:[%s271_s29 + $0x28] sm:$0xff] %v1556_v10  ;;  %v1559_v24 = vpop.f32.mrb[70].mxu1 }
 0x4af   : > { %v1560_v30 = vadd.f32 %v1559_v24, %v1473_v14  ;;  %v1561_v41 = vpop.f32.mrb[71].mxu1 }
 0x4b0   : > { %v1562_v15 = vadd.f32 %v1561_v41, %v1473_v14 }
 0x4b1   : > { %1570 = vst [vmem:[%s271_s29 + $0x30] sm:$0xff] %v1560_v30 }
 0x4b2   : > { %1571 = vst [vmem:[%s271_s29 + $0x38] sm:$0xff] %v1562_v15 }
 0x4b3   : > { %2042 = shalt.err (!%p2039_p3)
}
 0x4b4   : > { %s2043_s20 = scalar_lea.hbm %s2786_s15, 1024  ;;  %s2047_s23 = scalar_lea.hbm %s2840_s7, 2048 }
 0x4b5   : > { %p2044_p4 = scmp.ne.s32.totalorder %s2786_s15, %s2043_s20  ;;  %p2048_p9 = scmp.lt.u32.totalorder %s2786_s15, %s2840_s7 }
 0x4b6   : > { %p2049_p10 = scmp.lt.u32.totalorder %s2047_s23, %s2043_s20  ;;  %p2051_p12 = scmp.lt.u32.totalorder %s2043_s20, %s2786_s15 }
 0x4b7   : > { %p2045_p7 = pnand %p2044_p4, %p2176_p5 }
 0x4b8   : > { %p2050_p11 = por %p2049_p10, %p2048_p9 }
 0x4b9   : > { %p2046_p8 = pneg %p2045_p7 }
 0x4ba   : > { %p2052_p13 = por %p2051_p12, %p2050_p11 }
 0x4bc   : > { %p2053_p0 = pnand %p2052_p13, %p2046_p8 }
 0x4be   : > { %2056 = shalt.err (!%p2053_p0)
}
 0x4bf   : > { %s2096_s13 = smov 256   ;;  %s2097_s14 = smov 16  }
 0x4c0   : > { %1888 = dma.vmem_to_hbm [thread:$0]  (%p2176_p5), %s2788_s9, 1024, %s2786_s15, %s2792_s28, %s2096_s13, %s2096_s13, %s2097_s14  }
 0x4c1 PF: > { %p1894_p1 = scmp.ge.s32.totalorder %s2091_s27, 2  ;;  %s1601_s16 = sand.u32 1, %s2079_s24  }
 0x4c2   : > { %s1602_s17 = scalar_lea.sflag [#allocation3], %s1601_s16 }
 0x4c3   : > { %p1891_p2 = pnand %p1894_p1, %p2180_p6 }
 0x4c5   : > { %2074 = dma.done.wait (!%p1891_p2), %s1602_s17, 1024  }
 0x4c6   : > { %2076 = vsyncadd (!%p1891_p2), %s1602_s17, 4294966272  ;;  %p17_p3 = scmp.ge.s32.totalorder %s2163_s30, 4   ;;  %s2894_s24 = smov %s2083_s25 }
 0x4c7   : > { %s2895_s25 = smov %s2087_s26  ;;  %s2896_s26 = smov %s2174_s10 }
 0x4c8   : > { %s2897_s27 = smov %s2163_s30  ;;  %19 = sbr.rel (!%p17_p3) target bundleno = 3 (0x3), region = 83 }
 0x4cf   :  { %1607 = vsyncpa [#allocation3], 1 }
 0x4d0   :  { %1609 = vsyncpa [#allocation3 + $0x1], 1 }

</bundles_post_ra>
